<compile_context>
chip_gen: v7x
topology: tpu7x:2x2x1
jax: 0.10.0
libtpu: 0.0.40
codegen_flags: <defaults>
</compile_context>

<pallas_src>
import functools
import math

import jax
import jax.numpy as jnp
from jax import lax
from jax.experimental import pallas as pl
from jax.experimental.pallas import tpu as pltpu


_VMEM_LIMIT = 32 * 1024 * 1024  # explicit scoped-VMEM cap; safe on v5e/v6e/v7x


# ----------------------------------------------------------------------------- #
# Tiling heuristics
# ----------------------------------------------------------------------------- #
def _pick_tn(taps, cin, cout):
    """Cout tile: full Cout when small, else 128/256 keeping the bf16 weight
    block (double buffered) comfortably bounded."""
    if cout % 128 != 0:
        return cout
    if cout % 256 == 0 and taps * cin * 256 * 2 <= (2 << 20):
        return 256
    return 128


def _pick_row_tile(ho, wp, tn, cap=(1 << 20)):
    """Output rows per conv grid step, in units of whole image rows.  Bounds
    the local f32 accumulator and gives the grid a parallel row axis (megacore
    split on v7x) at larger inputs.  The block's second-minor extent (d*wp)
    must be a multiple of 8 or the full extent."""
    for d in range(ho, 0, -1):
        if ho % d:
            continue
        if d != ho and (d * wp) % 8 != 0:
            continue
        if d * wp * tn * 4 <= cap:
            return d
    return ho


def _pick_th(ho, per_row_bytes, cap=(8 << 20)):
    """Row band for the affine/BN kernel (bigger bands -> closer to the HBM
    roofline); second-minor extent must be a multiple of 8 or the full Ho."""
    for d in range(ho, 0, -1):
        if ho % d == 0 and (d % 8 == 0 or d == ho) and d * per_row_bytes <= cap:
            return d
    return ho


# ----------------------------------------------------------------------------- #
# Pallas kernels
# ----------------------------------------------------------------------------- #
def _make_conv_kernel(tap_offsets, th_rows, n_row_tiles):
    """Implicit-GEMM conv kernel.

    x_ref: (1, img_rows, Cin) bf16 -- whole padded image, flattened (row,col)
    w_ref: (T, Cin, TN)       bf16
    b_ref: (1, TN)            f32
    o_ref: (1, th_rows, TN)   bf16 -- 'wide' conv output tile (rows = d*Wp)

    All taps accumulate into a local f32 value; o_ref is written exactly once.
    """
    def kernel(x_ref, w_ref, b_ref, o_ref):
        if n_row_tiles > 1:
            r0 = pl.multiple_of(pl.program_id(2) * th_rows, th_rows)
        acc = None
        for t, off in enumerate(tap_offsets):
            if n_row_tiles > 1:
                a = x_ref[0, pl.ds(r0 + off, th_rows), :]
            else:
                a = x_ref[0, off:off + th_rows, :]
            c = jnp.dot(a, w_ref[t], preferred_element_type=jnp.float32)
            acc = c if acc is None else acc + c
        o_ref[0] = (acc + b_ref[...]).astype(o_ref.dtype)

    return kernel


def _conv_pallas_core(x3, w3, b2, Ho, Wp, tap_offsets):
    """x3: (N, img_rows, Cin) bf16; w3: (T, Cin, Cout) bf16; b2: (1, Cout) f32.
    Returns the 'wide' conv result (N, Ho*Wp, Cout) bf16."""
    N, img_rows, Cin = x3.shape
    T, _, Cout = w3.shape
    rows = Ho * Wp
    TN = _pick_tn(T, Cin, Cout)
    d = _pick_row_tile(Ho, Wp, TN)
    th_rows = d * Wp
    n_row = Ho // d
    kern = _make_conv_kernel(tuple(tap_offsets), th_rows, n_row)
    return pl.pallas_call(
        kern,
        out_shape=jax.ShapeDtypeStruct((N, rows, Cout), jnp.bfloat16),
        grid_spec=pltpu.PrefetchScalarGridSpec(
            num_scalar_prefetch=0,
            grid=(N, Cout // TN, n_row),
            in_specs=[
                pl.BlockSpec((1, img_rows, Cin), lambda n, j, r: (n, 0, 0)),
                pl.BlockSpec((T, Cin, TN), lambda n, j, r: (0, 0, j)),
                pl.BlockSpec((1, TN), lambda n, j, r: (0, j)),
            ],
            out_specs=pl.BlockSpec((1, th_rows, TN), lambda n, j, r: (n, r, j)),
        ),
        compiler_params=pltpu.CompilerParams(
            dimension_semantics=("parallel", "parallel", "parallel"),
            vmem_limit_bytes=_VMEM_LIMIT),
    )(x3, w3, b2)


def _make_affine_kernel(has_res, relu, woc):
    """Lane-dense fused BN-affine (+residual) (+ReLU).

    y_ref:   (1, TH, Wp*C) bf16  (wide conv output, flattened lanes)
    res_ref: (1, TH, Wo*C) (optional, bf16 or f32)
    s/t_ref: (1, 1, Wo*C)  f32   (per-channel scale/shift tiled to Wo*C)
    o_ref:   (1, TH, Wo*C) f32
    """
    def kernel(*refs):
        if has_res:
            y_ref, res_ref, s_ref, t_ref, o_ref = refs
        else:
            y_ref, s_ref, t_ref, o_ref = refs
            res_ref = None
        out = y_ref[:, :, :woc].astype(jnp.float32) * s_ref[...] + t_ref[...]
        if has_res:
            out = out + res_ref[...].astype(jnp.float32)
        if relu:
            out = jnp.maximum(out, 0.0)
        o_ref[...] = out

    return kernel


# ----------------------------------------------------------------------------- #
# Convolution primitives (jitted per-shape, Pallas on the hot path)
# ----------------------------------------------------------------------------- #
@functools.partial(jax.jit, static_argnames=('khw', 'padding'))
def _conv_s1(x, w3, b2, *, khw, padding):
    """Stride-1 conv, implicit GEMM, no HBM im2col.  Returns the 'wide'
    result (N, Ho, Wp*Cout) bf16; only the first Wo columns of each row are
    valid."""
    KH, KW = khw
    N, H, W, Cin = x.shape
    Hp, Wp = H + 2 * padding, W + 2 * padding
    Ho = Hp - KH + 1
    extra = 1 if KW > 1 else 0            # guard row so tap slices stay in-bounds
    xp = jnp.pad(x.astype(jnp.bfloat16),
                 ((0, 0), (padding, padding + extra), (padding, padding), (0, 0)))
    x3 = xp.reshape(N, (Hp + extra) * Wp, Cin)
    taps = tuple(kh * Wp + kw for kh in range(KH) for kw in range(KW))
    y = _conv_pallas_core(x3, w3, b2, Ho, Wp, taps)
    return y.reshape(N, Ho, Wp * w3.shape[2])


@functools.partial(jax.jit, static_argnames=('khw', 'stride', 'padding'))
def _conv_strided(x, w3, b2, *, khw, stride, padding):
    """Fallback for the few stride>1 KxK convs (stem 7x7 + 3 backbone 3x3).
    Inputs are tiny, so a small bf16 im2col here is harmless."""
    KH, KW = khw
    N, H, W, Cin = x.shape
    T, _, Cout = w3.shape
    Ho = (H + 2 * padding - KH) // stride + 1
    Wo = (W + 2 * padding - KW) // stride + 1
    xp = jnp.pad(x.astype(jnp.bfloat16),
                 ((0, 0), (padding, padding), (padding, padding), (0, 0)))
    cols = [xp[:, i:i + stride * (Ho - 1) + 1:stride,
               j:j + stride * (Wo - 1) + 1:stride, :]
            for i in range(KH) for j in range(KW)]
    pat = jnp.concatenate(cols, axis=-1)                    # (N, Ho, Wo, T*Cin)
    K = T * Cin
    x3 = pat.reshape(N, Ho * Wo, K)
    wf = w3.reshape(1, K, Cout)
    y = _conv_pallas_core(x3, wf, b2, Ho, Wo, (0,))
    return y.reshape(N, Ho, Wo * Cout)


def conv_wide(x, p, stride=1, padding=0):
    """Raw conv (bias fused into the Pallas epilogue).
    Returns (y_wide, Ho, Wp, Wo, Cout); y_wide is (N, Ho, Wp*Cout) bf16."""
    KH, KW = p['khw']
    Cout = p['w3'].shape[2]
    if stride == 1:
        N, H, W, Cin = x.shape
        Wp = W + 2 * padding
        Ho = H + 2 * padding - KH + 1
        Wo = Wp - KW + 1
        y = _conv_s1(x, p['w3'], p['b2'], khw=(KH, KW), padding=padding)
        return y, Ho, Wp, Wo, Cout
    if KH == 1 and KW == 1:               # 1x1 stride-2 downsample convs
        xs = x[:, ::stride, ::stride, :]
        y = _conv_s1(xs, p['w3'], p['b2'], khw=(1, 1), padding=0)
        return y, xs.shape[1], xs.shape[2], xs.shape[2], Cout
    y = _conv_strided(x, p['w3'], p['b2'], khw=(KH, KW),
                      stride=stride, padding=padding)
    Ho = (x.shape[1] + 2 * padding - KH) // stride + 1
    Wo = (x.shape[2] + 2 * padding - KW) // stride + 1
    return y, Ho, Wo, Wo, Cout


@functools.partial(jax.jit, static_argnames=('dims', 'relu', 'has_res'))
def _bn_act(y, gamma, beta, res, *, dims, relu, has_res):
    """Train-mode BatchNorm (one-pass batch stats) + lane-dense Pallas affine
    (+ optional residual) (+ ReLU) on a single wide conv output."""
    Ho, Wp, Wo, C = dims
    N = y.shape[0]
    # One fused XLA pass over the valid region of the bf16 wide output.
    yn = y.reshape(N, Ho, Wp, C)[:, :, :Wo, :].astype(jnp.float32)
    cnt = float(N * Ho * Wo)
    mean = jnp.sum(yn, axis=(0, 1, 2)) / cnt
    var = jnp.maximum(jnp.sum(yn * yn, axis=(0, 1, 2)) / cnt - mean * mean, 0.0)
    scale = gamma * lax.rsqrt(var + 1e-5)
    shift = beta - mean * scale

    woc, wpc = Wo * C, Wp * C
    scale_t = jnp.tile(scale, Wo).reshape(1, 1, woc)
    shift_t = jnp.tile(shift, Wo).reshape(1, 1, woc)

    per_row = 2 * (wpc * 2 + 2 * woc * 4 + (woc * 4 if has_res else 0))
    TH = _pick_th(Ho, per_row)
    kern = _make_affine_kernel(has_res, bool(relu), woc)

    in_specs = [pl.BlockSpec((1, TH, wpc), lambda n, i: (n, i, 0))]
    args = [y]
    if has_res:
        in_specs.append(pl.BlockSpec((1, TH, woc), lambda n, i: (n, i, 0)))
        args.append(res)
    in_specs += [pl.BlockSpec((1, 1, woc), lambda n, i: (0, 0, 0))] * 2
    args += [scale_t, shift_t]

    out = pl.pallas_call(
        kern,
        out_shape=jax.ShapeDtypeStruct((N, Ho, woc), jnp.float32),
        grid_spec=pltpu.PrefetchScalarGridSpec(
            num_scalar_prefetch=0,
            grid=(N, Ho // TH),
            in_specs=in_specs,
            out_specs=pl.BlockSpec((1, TH, woc), lambda n, i: (n, i, 0)),
        ),
        compiler_params=pltpu.CompilerParams(
            dimension_semantics=("parallel", "parallel"),
            vmem_limit_bytes=_VMEM_LIMIT),
    )(*args)
    return out.reshape(N, Ho, Wo, C)


def bn_act(y, Ho, Wp, Wo, C, pbn, res=None, relu=True):
    if res is not None and res.ndim == 4:
        res = res.reshape(res.shape[0], Ho, Wo * C)
    return _bn_act(y, pbn['gamma'], pbn['beta'], res,
                   dims=(int(Ho), int(Wp), int(Wo), int(C)),
                   relu=bool(relu), has_res=res is not None)


def conv_bn_act(x, pconv, pbn, relu=True, stride=1, padding=0, res=None):
    y, Ho, Wp, Wo, C = conv_wide(x, pconv, stride, padding)
    return bn_act(y, Ho, Wp, Wo, C, pbn, res=res, relu=relu)


def fuse_conv_params(ps):
    """Stack sibling convs (same KHxKW, same Cout) along Cin: one bigger GEMM
    replaces the sum of several small ones."""
    return {'w3': jnp.concatenate([q['w3'] for q in ps], axis=1),
            'b2': functools.reduce(jnp.add, [q['b2'] for q in ps]),
            'khw': ps[0]['khw']}


def fused_conv_bn_act(pairs, pbn, relu=True, padding=1, res=None):
    x = jnp.concatenate([xx for xx, _ in pairs], axis=-1)
    pc = fuse_conv_params([pp for _, pp in pairs])
    return conv_bn_act(x, pc, pbn, relu=relu, stride=1, padding=padding, res=res)


# ----------------------------------------------------------------------------- #
# Pooling / resize glue (XLA) and the Cout=1 classifier
# ----------------------------------------------------------------------------- #
def avgpool2x2(x):  # nn.AvgPool2d((2,2), stride=2)
    N, H, W, C = x.shape
    return x.reshape(N, H // 2, 2, W // 2, 2, C).mean(axis=(2, 4))


def maxpool3x3_s2_p1(x):  # ResNet stem maxpool
    return lax.reduce_window(x, -jnp.inf, lax.max, (1, 3, 3, 1), (1, 2, 2, 1),
                             ((0, 0), (1, 1), (1, 1), (0, 0)))


def up_nearest2(x):  # nn.Upsample(scale_factor=2, mode='nearest')
    return jnp.repeat(jnp.repeat(x, 2, axis=1), 2, axis=2)


def bilinear_resize(x, size):
    # F.interpolate(..., mode='bilinear', align_corners=False)
    N, _, _, C = x.shape
    return jax.image.resize(x, (N, size[0], size[1], C), method='bilinear')


def upsample_add(x_small, y):
    return y + bilinear_resize(x_small, (y.shape[1], y.shape[2]))


def classifier_fwd(p, x):
    # 1x1 conv with Cout=1: plain XLA contraction (MXU would be ~1% utilised).
    w = p['w3'][0].astype(jnp.float32)              # (Cin, 1)
    return jnp.tensordot(x, w, axes=([3], [0])) + p['b2'].reshape(1, 1, 1, -1)


# ----------------------------------------------------------------------------- #
# Deterministic parameter construction (weights pre-reshaped + pre-cast)
# ----------------------------------------------------------------------------- #
class PRNG:
    def __init__(self, seed=0):
        self._base = jax.random.PRNGKey(seed)
        self._i = 0

    def next(self):
        k = jax.random.fold_in(self._base, self._i)
        self._i += 1
        return k


def conv_p(rng, kh, kw, cin, cout, bias=True, wdtype=jnp.bfloat16):
    std = 1.0 / math.sqrt(kh * kw * cin)
    w = std * jax.random.normal(rng.next(), (kh, kw, cin, cout), jnp.float32)
    if bias:
        b = 0.01 * jax.random.normal(rng.next(), (cout,), jnp.float32)
    else:
        b = jnp.zeros((cout,), jnp.float32)
    return {'w3': w.reshape(kh * kw, cin, cout).astype(wdtype),
            'b2': b.reshape(1, cout),
            'khw': (kh, kw)}


def bn_p(c):
    return {'gamma': jnp.ones((c,), jnp.float32),
            'beta': jnp.zeros((c,), jnp.float32)}


def make_backbone(rng):
    P = {'stem_conv': conv_p(rng, 7, 7, 3, 64, bias=False), 'stem_bn': bn_p(64)}

    def make_layer(inplanes, planes, blocks, stride):
        layer = []
        for b in range(blocks):
            s = stride if b == 0 else 1
            blk = {'stride': s,
                   'conv1': conv_p(rng, 1, 1, inplanes, planes, False), 'bn1': bn_p(planes),
                   'conv2': conv_p(rng, 3, 3, planes, planes, False), 'bn2': bn_p(planes),
                   'conv3': conv_p(rng, 1, 1, planes, planes * 4, False), 'bn3': bn_p(planes * 4)}
            if b == 0 and (s != 1 or inplanes != planes * 4):
                blk['down'] = conv_p(rng, 1, 1, inplanes, planes * 4, False)
                blk['down_bn'] = bn_p(planes * 4)
            layer.append(blk)
            inplanes = planes * 4
        return layer

    P['layer1'] = make_layer(64, 64, 3, 1)
    P['layer2'] = make_layer(256, 128, 4, 2)
    P['layer3'] = make_layer(512, 256, 6, 2)
    P['layer4'] = make_layer(1024, 512, 3, 2)
    return P


def make_conv_2nV1(rng, in_hc, in_lc, out_c, main):
    mid = min(in_hc, in_lc)
    p = {'main': main,
         'h2h_0': conv_p(rng, 3, 3, in_hc, mid), 'l2l_0': conv_p(rng, 3, 3, in_lc, mid),
         'bnh_0': bn_p(mid), 'bnl_0': bn_p(mid),
         'h2h_1': conv_p(rng, 3, 3, mid, mid), 'h2l_1': conv_p(rng, 3, 3, mid, mid),
         'l2h_1': conv_p(rng, 3, 3, mid, mid), 'l2l_1': conv_p(rng, 3, 3, mid, mid),
         'bnl_1': bn_p(mid), 'bnh_1': bn_p(mid)}
    if main == 0:
        p.update({'h2h_2': conv_p(rng, 3, 3, mid, mid), 'l2h_2': conv_p(rng, 3, 3, mid, mid),
                  'bnh_2': bn_p(mid), 'h2h_3': conv_p(rng, 3, 3, mid, out_c),
                  'bnh_3': bn_p(out_c), 'identity': conv_p(rng, 1, 1, in_hc, out_c)})
    else:
        p.update({'h2l_2': conv_p(rng, 3, 3, mid, mid), 'l2l_2': conv_p(rng, 3, 3, mid, mid),
                  'bnl_2': bn_p(mid), 'l2l_3': conv_p(rng, 3, 3, mid, out_c),
                  'bnl_3': bn_p(out_c), 'identity': conv_p(rng, 1, 1, in_lc, out_c)})
    return p


def make_conv_3nV1(rng, in_hc, in_mc, in_lc, out_c):
    mid = min(in_hc, in_mc, in_lc)
    p = {'h2h_0': conv_p(rng, 3, 3, in_hc, mid), 'm2m_0': conv_p(rng, 3, 3, in_mc, mid),
         'l2l_0': conv_p(rng, 3, 3, in_lc, mid),
         'bnh_0': bn_p(mid), 'bnm_0': bn_p(mid), 'bnl_0': bn_p(mid)}
    for n in ['h2h_1', 'h2m_1', 'm2h_1', 'm2m_1', 'm2l_1', 'l2m_1', 'l2l_1',
              'h2m_2', 'l2m_2', 'm2m_2']:
        p[n] = conv_p(rng, 3, 3, mid, mid)
    p.update({'bnh_1': bn_p(mid), 'bnm_1': bn_p(mid), 'bnl_1': bn_p(mid), 'bnm_2': bn_p(mid),
              'm2m_3': conv_p(rng, 3, 3, mid, out_c), 'bnm_3': bn_p(out_c),
              'identity': conv_p(rng, 1, 1, in_mc, out_c)})
    return p


def make_sim(rng, hC, lC):
    return {'h2l_0': conv_p(rng, 3, 3, hC, lC), 'h2h_0': conv_p(rng, 3, 3, hC, hC),
            'bnl_0': bn_p(lC), 'bnh_0': bn_p(hC),
            'h2h_1': conv_p(rng, 3, 3, hC, hC), 'h2l_1': conv_p(rng, 3, 3, hC, lC),
            'l2h_1': conv_p(rng, 3, 3, lC, hC), 'l2l_1': conv_p(rng, 3, 3, lC, lC),
            'bnl_1': bn_p(lC), 'bnh_1': bn_p(hC),
            'h2h_2': conv_p(rng, 3, 3, hC, hC), 'l2h_2': conv_p(rng, 3, 3, lC, hC),
            'bnh_2': bn_p(hC)}


def make_basic_conv(rng, cin, cout):
    return {'conv': conv_p(rng, 3, 3, cin, cout, bias=False), 'bn': bn_p(cout)}


def build_params(seed=0):
    rng = PRNG(seed)
    P = {'backbone': make_backbone(rng)}
    P['aim'] = {'conv0': make_conv_2nV1(rng, 64, 256, 64, main=0),
                'conv1': make_conv_3nV1(rng, 64, 256, 512, 64),
                'conv2': make_conv_3nV1(rng, 256, 512, 1024, 64),
                'conv3': make_conv_3nV1(rng, 512, 1024, 2048, 64),
                'conv4': make_conv_2nV1(rng, 1024, 2048, 64, main=1)}
    for name in ['sim32', 'sim16', 'sim8', 'sim4', 'sim2']:
        P[name] = make_sim(rng, 64, 32)
    P['upconv32'] = make_basic_conv(rng, 64, 64)
    P['upconv16'] = make_basic_conv(rng, 64, 64)
    P['upconv8'] = make_basic_conv(rng, 64, 64)
    P['upconv4'] = make_basic_conv(rng, 64, 64)
    P['upconv2'] = make_basic_conv(rng, 64, 32)
    P['upconv1'] = make_basic_conv(rng, 32, 32)
    P['classifier'] = conv_p(rng, 1, 1, 32, 1, bias=True, wdtype=jnp.float32)
    return P


# ----------------------------------------------------------------------------- #
# Module forwards
# ----------------------------------------------------------------------------- #
def bottleneck_fwd(p, x):
    s = p['stride']
    h1 = conv_bn_act(x, p['conv1'], p['bn1'], True, 1, 0)
    h2 = conv_bn_act(h1, p['conv2'], p['bn2'], True, s, 1)
    if 'down' in p:
        idn = conv_bn_act(x, p['down'], p['down_bn'], False, s, 0)
    else:
        idn = x
    return conv_bn_act(h2, p['conv3'], p['bn3'], True, 1, 0, res=idn)


def layer_fwd(blocks, x):
    for b in blocks:
        x = bottleneck_fwd(b, x)
    return x


def conv_2nV1_fwd(p, in_h, in_l):
    h = conv_bn_act(in_h, p['h2h_0'], p['bnh_0'], True, 1, 1)
    l = conv_bn_act(in_l, p['l2l_0'], p['bnl_0'], True, 1, 1)
    # fused sibling convs: one conv with channel-concatenated input
    h1 = fused_conv_bn_act([(h, p['h2h_1']), (up_nearest2(l), p['l2h_1'])], p['bnh_1'])
    l1 = fused_conv_bn_act([(l, p['l2l_1']), (avgpool2x2(h), p['h2l_1'])], p['bnl_1'])
    if p['main'] == 0:
        h_fuse = fused_conv_bn_act([(h1, p['h2h_2']), (up_nearest2(l1), p['l2h_2'])],
                                   p['bnh_2'])
        res, _, _, _, _ = conv_wide(in_h, p['identity'], 1, 0)   # wide == narrow (1x1)
        return conv_bn_act(h_fuse, p['h2h_3'], p['bnh_3'], True, 1, 1, res=res)
    else:
        l_fuse = fused_conv_bn_act([(avgpool2x2(h1), p['h2l_2']), (l1, p['l2l_2'])],
                                   p['bnl_2'])
        res, _, _, _, _ = conv_wide(in_l, p['identity'], 1, 0)
        return conv_bn_act(l_fuse, p['l2l_3'], p['bnl_3'], True, 1, 1, res=res)


def conv_3nV1_fwd(p, in_h, in_m, in_l):
    h = conv_bn_act(in_h, p['h2h_0'], p['bnh_0'], True, 1, 1)
    m = conv_bn_act(in_m, p['m2m_0'], p['bnm_0'], True, 1, 1)
    l = conv_bn_act(in_l, p['l2l_0'], p['bnl_0'], True, 1, 1)
    h1 = fused_conv_bn_act([(h, p['h2h_1']), (up_nearest2(m), p['m2h_1'])], p['bnh_1'])
    m1 = fused_conv_bn_act([(avgpool2x2(h), p['h2m_1']), (m, p['m2m_1']),
                            (up_nearest2(l), p['l2m_1'])], p['bnm_1'])
    l1 = fused_conv_bn_act([(avgpool2x2(m), p['m2l_1']), (l, p['l2l_1'])], p['bnl_1'])
    m2 = fused_conv_bn_act([(avgpool2x2(h1), p['h2m_2']), (m1, p['m2m_2']),
                            (up_nearest2(l1), p['l2m_2'])], p['bnm_2'])
    res, _, _, _, _ = conv_wide(in_m, p['identity'], 1, 0)
    return conv_bn_act(m2, p['m2m_3'], p['bnm_3'], True, 1, 1, res=res)


def sim_fwd(p, x):
    h, w = x.shape[1], x.shape[2]
    x_h = conv_bn_act(x, p['h2h_0'], p['bnh_0'], True, 1, 1)
    x_l = conv_bn_act(avgpool2x2(x), p['h2l_0'], p['bnl_0'], True, 1, 1)
    xh1 = fused_conv_bn_act([(x_h, p['h2h_1']),
                             (bilinear_resize(x_l, (h, w)), p['l2h_1'])], p['bnh_1'])
    xl1 = fused_conv_bn_act([(x_l, p['l2l_1']),
                             (avgpool2x2(x_h), p['h2l_1'])], p['bnl_1'])
    xh2 = fused_conv_bn_act([(xh1, p['h2h_2']),
                             (bilinear_resize(xl1, (h, w)), p['l2h_2'])], p['bnh_2'])
    return xh2 + x


def basic_conv_fwd(p, x):
    return conv_bn_act(x, p['conv'], p['bn'], True, 1, 1)


def minet_forward(P, in_data_nchw):
    x = jnp.transpose(in_data_nchw, (0, 2, 3, 1)).astype(jnp.float32)  # NCHW -> NHWC
    bb = P['backbone']
    d2 = conv_bn_act(x, bb['stem_conv'], bb['stem_bn'], True, stride=2, padding=3)
    d4 = layer_fwd(bb['layer1'], maxpool3x3_s2_p1(d2))
    d8 = layer_fwd(bb['layer2'], d4)
    d16 = layer_fwd(bb['layer3'], d8)
    d32 = layer_fwd(bb['layer4'], d16)

    t2 = conv_2nV1_fwd(P['aim']['conv0'], d2, d4)
    t4 = conv_3nV1_fwd(P['aim']['conv1'], d2, d4, d8)
    t8 = conv_3nV1_fwd(P['aim']['conv2'], d4, d8, d16)
    t16 = conv_3nV1_fwd(P['aim']['conv3'], d8, d16, d32)
    t32 = conv_2nV1_fwd(P['aim']['conv4'], d16, d32)

    o32 = basic_conv_fwd(P['upconv32'], sim_fwd(P['sim32'], t32))
    o16 = basic_conv_fwd(P['upconv16'], sim_fwd(P['sim16'], upsample_add(o32, t16)))
    o8 = basic_conv_fwd(P['upconv8'], sim_fwd(P['sim8'], upsample_add(o16, t8)))
    o4 = basic_conv_fwd(P['upconv4'], sim_fwd(P['sim4'], upsample_add(o8, t4)))
    o2 = basic_conv_fwd(P['upconv2'], sim_fwd(P['sim2'], upsample_add(o4, t2)))
    o1 = basic_conv_fwd(P['upconv1'],
                        bilinear_resize(o2, (o2.shape[1] * 2, o2.shape[2] * 2)))
    out = classifier_fwd(P['classifier'], o1)
    return jnp.transpose(out, (0, 3, 1, 2))  # back to NCHW


# ----------------------------------------------------------------------------- #
if __name__ == "__main__":
    # 64x64 is the smallest input the architecture supports (need 2x2 at /32 so
    # the SIM's 2x2 avg-pool is valid).  Channel counts are fixed by the module.
    key = jax.random.PRNGKey(0)
    in_data = jax.random.normal(key, (1, 3, 64, 64), jnp.float32)

    params = build_params(seed=0)
    out = minet_forward(params, in_data)
    out = jax.block_until_ready(out)

    assert out.shape == (1, 1, 64, 64), out.shape
    assert out.dtype == jnp.float32
    assert bool(jnp.all(jnp.isfinite(out)))
    print("KERNEL_OK")
</pallas_src>

<mosaic_0001>
module attributes {stable_mosaic.version = 11 : i64} {
  func.func @kernel(%arg0: i32, %arg1: i32, %arg2: i32, %arg3: memref<1x1024x147xbf16, #tpu.memory_space<vmem>>, %arg4: memref<1x147x64xbf16, #tpu.memory_space<vmem>>, %arg5: memref<1x64xf32, #tpu.memory_space<vmem>>, %arg6: memref<1x1024x64xbf16, #tpu.memory_space<vmem>>) attributes {dimension_semantics = [#tpu.dimension_semantics<parallel>, #tpu.dimension_semantics<parallel>, #tpu.dimension_semantics<parallel>], iteration_bounds = array<i64: 1, 1, 1>, scalar_prefetch = 0 : i64, scratch_operands = 0 : i64, tpu.core_type = #tpu.core_type<tc>, window_params = [{transform_indices = @transform_0, window_bounds = array<i64: 1, 1024, 147>}, {transform_indices = @transform_1, window_bounds = array<i64: 1, 147, 64>}, {transform_indices = @transform_2, window_bounds = array<i64: 1, 64>}, {transform_indices = @transform_3, window_bounds = array<i64: 1, 1024, 64>}]} {
    %c0 = arith.constant 0 : index
    %c0_0 = arith.constant 0 : index
    %c0_1 = arith.constant 0 : index
    %0 = vector.load %arg3[%c0, %c0_0, %c0_1] : memref<1x1024x147xbf16, #tpu.memory_space<vmem>>, vector<1x1024x147xbf16>
    %1 = vector.shape_cast %0 : vector<1x1024x147xbf16> to vector<1024x147xbf16>
    %c0_2 = arith.constant 0 : index
    %c0_3 = arith.constant 0 : index
    %c0_4 = arith.constant 0 : index
    %2 = vector.load %arg4[%c0_2, %c0_3, %c0_4] : memref<1x147x64xbf16, #tpu.memory_space<vmem>>, vector<1x147x64xbf16>
    %3 = vector.shape_cast %2 : vector<1x147x64xbf16> to vector<147x64xbf16>
    %cst = arith.constant dense<0.000000e+00> : vector<1024x64xf32>
    %4 = tpu.matmul %1, %3, %cst {dimension_numbers = #tpu.dot_dimension_numbers<[1], [0], [0], [1], [0, 0, 1, 1], [], []>} : vector<1024x147xbf16>, vector<147x64xbf16>, vector<1024x64xf32> -> vector<1024x64xf32>
    %c0_5 = arith.constant 0 : index
    %c0_6 = arith.constant 0 : index
    %5 = vector.load %arg5[%c0_5, %c0_6] : memref<1x64xf32, #tpu.memory_space<vmem>>, vector<1x64xf32>
    %6 = vector.broadcast %5 : vector<1x64xf32> to vector<1024x64xf32>
    %7 = arith.addf %4, %6 : vector<1024x64xf32>
    %8 = arith.truncf %7 : vector<1024x64xf32> to vector<1024x64xbf16>
    %c0_7 = arith.constant 0 : index
    %c0_8 = arith.constant 0 : index
    %c0_9 = arith.constant 0 : index
    %9 = vector.load %arg6[%c0_7, %c0_8, %c0_9] : memref<1x1024x64xbf16, #tpu.memory_space<vmem>>, vector<1x1024x64xbf16>
    %10 = vector.shape_cast %9 : vector<1x1024x64xbf16> to vector<1024x64xbf16>
    %11 = vector.shape_cast %8 : vector<1024x64xbf16> to vector<1x1024x64xbf16>
    tpu.vector_store %arg6[%c0_7, %c0_8, %c0_9], %11 {strides = array<i32>} : memref<1x1024x64xbf16, #tpu.memory_space<vmem>>, vector<1x1024x64xbf16>,
    return
  }
  func.func @transform_0(%arg0: i32, %arg1: i32, %arg2: i32) -> (i32, i32, i32) {
    %c0_i32 = arith.constant 0 : i32
    %c0_i32_0 = arith.constant 0 : i32
    %c0_i32_1 = arith.constant 0 : i32
    return %arg0, %c0_i32, %c0_i32_0 : i32, i32, i32
  }
  func.func @transform_1(%arg0: i32, %arg1: i32, %arg2: i32) -> (i32, i32, i32) {
    %c0_i32 = arith.constant 0 : i32
    %c0_i32_0 = arith.constant 0 : i32
    %c0_i32_1 = arith.constant 0 : i32
    return %c0_i32, %c0_i32_0, %arg1 : i32, i32, i32
  }
  func.func @transform_2(%arg0: i32, %arg1: i32, %arg2: i32) -> (i32, i32) {
    %c0_i32 = arith.constant 0 : i32
    %c0_i32_0 = arith.constant 0 : i32
    return %c0_i32, %arg1 : i32, i32
  }
  func.func @transform_3(%arg0: i32, %arg1: i32, %arg2: i32) -> (i32, i32, i32) {
    %c0_i32 = arith.constant 0 : i32
    return %arg0, %arg2, %arg1 : i32, i32, i32
  }
}

</mosaic_0001>

<bundles_post_ra>
// kernel: _conv_strided.1
= control target key start
LH: loop header
LB: loop body
LE: loop exit
PB: predicated region body
PF: predicated region fallthrough
CT: control target
= control target key end

     0   :  { %v2876_v0 = vmov 0   ;;  %vm802_vm0 = vcmask 154624   ;;  %vm995_vm1 = vcmask 1040384   ;;  %vm996_vm2 = vcmask 1041408   ;;  %s4026_s1 = inlined_call_operand.vmem [shape: bf16[1,147,64], index: 1, kind: input, shape index: {}]   ;;  %s4027_s0 = inlined_call_operand.vmem [shape: bf16[1,1024,147], index: 0, kind: input, shape index: {}]   ;;  %s4028_s2 = inlined_call_operand.vmem [shape: f32[1,64], index: 2, kind: input, shape index: {}]   ;;  %s4029_s3 = inlined_call_operand.vmem [shape: bf16[1,1024,64], index: 3, kind: output, shape index: {}]  }
   0x1   :  { %1002 = vmatprep.subr.bf16.mxu0 %v2876_v0  ;;  %2651 = vmatprep.subr.bf16.mxu1 %v2876_v0  ;;  %v2673_v1 = vld [vmem:[%s4026_s1] sm:$0xff]   ;;  %v2674_v2 = vld [vmem:[%s4026_s1 + $0x8] sm:$0xff]   ;;  %v2675_v3 = vld [vmem:[%s4026_s1 + $0x10] sm:$0xff]   ;;  %v2877_v11 = vmov 65535   ;;  %vm2059_vm3 = vcmask 519168  }
   0x2   :  { %1003 = vmatpush1.bf16.msra.mxu0 %v2673_v1  ;;  %2661 = vmatpush1.bf16.msra.mxu1 %v2673_v1  ;;  %v2676_v4 = vld [vmem:[%s4026_s1 + $0x18] sm:$0xff]   ;;  %v2685_v5 = vld [vmem:[%s4027_s0 + $0x4] ss:$8 sps:$4 sm:$0xff]   ;;  %v2679_v9 = vld [vmem:[%s4026_s1 + $0x30] sm:$0xff]   ;;  %v997_v12 = vsel %vm995_vm1, 4294967295, %v2877_v11 }
   0x3   :  { %1004 = vmatprep.subr.bf16.mxu0 %v2876_v0  ;;  %2652 = vmatprep.subr.bf16.mxu1 %v2876_v0  ;;  %v2688_v6 = vld [vmem:[%s4027_s0 + $0x204] ss:$8 sps:$4 sm:$0xff]   ;;  %v2680_v10 = vld [vmem:[%s4026_s1 + $0x38] sm:$0xff]   ;;  %v2682_v14 = vld [vmem:[%s4026_s1 + $0x48] ss:$0 sps:$4 sm:$0x33]  }
   0x4   :  { %2331 = vmatprep.mubr.msk.bf16.mxu0 %vm802_vm0, %v2685_v5  ;;  %v2677_v7 = vld [vmem:[%s4026_s1 + $0x20] sm:$0xff]   ;;  %2363 = vmatprep.mubr.msk.bf16.mxu1 %vm802_vm0, %v2688_v6  ;;  %v2678_v8 = vld [vmem:[%s4026_s1 + $0x28] sm:$0xff]   ;;  %v998_v15 = vsel %vm996_vm2, %v997_v12, 0  ;;  %v2689_v19 = vld [vmem:[%s4027_s0 + $0x14] ss:$8 sps:$4 sm:$0xff]  }
   0x5   :  { %v2681_v13 = vld [vmem:[%s4026_s1 + $0x40] sm:$0xff]   ;;  %v1000_v16 = vand.u32 %v2682_v14, %v998_v15  ;;  %v2691_v20 = vld [vmem:[%s4027_s0 + $0x214] ss:$8 sps:$4 sm:$0xff]   ;;  %v2693_v21 = vld [vmem:[%s4027_s0 + $0x10] ss:$8 sps:$4 sm:$0xff]  }
   0x6   :  { %1005 = vmatpush1.bf16.msra.mxu0 %v2674_v2  ;;  %2662 = vmatpush1.bf16.msra.mxu1 %v2674_v2  ;;  %v2683_v17 = vld [vmem:[%s4027_s0] ss:$8 sps:$4 sm:$0xff]   ;;  %v2694_v22 = vld [vmem:[%s4027_s0 + $0x210] ss:$8 sps:$4 sm:$0xff]   ;;  %v2695_v23 = vld [vmem:[%s4027_s0 + $0x24] ss:$8 sps:$4 sm:$0xff]  }
   0x7   :  { %1006 = vmatprep.subr.bf16.mxu0 %v2876_v0  ;;  %2653 = vmatprep.subr.bf16.mxu1 %v2876_v0  ;;  %v2686_v18 = vld [vmem:[%s4027_s0 + $0x200] ss:$8 sps:$4 sm:$0xff]   ;;  %v2697_v24 = vld [vmem:[%s4027_s0 + $0x224] ss:$8 sps:$4 sm:$0xff]   ;;  %v2701_v27 = vld [vmem:[%s4027_s0 + $0x34] ss:$8 sps:$4 sm:$0xff]  }
   0x8   :  { %v2699_v25 = vld [vmem:[%s4027_s0 + $0x20] ss:$8 sps:$4 sm:$0xff]   ;;  %v2703_v28 = vld [vmem:[%s4027_s0 + $0x234] ss:$8 sps:$4 sm:$0xff]   ;;  %v2705_v29 = vld [vmem:[%s4027_s0 + $0x30] ss:$8 sps:$4 sm:$0xff]  }
   0x9   :  { %v2700_v26 = vld [vmem:[%s4027_s0 + $0x220] ss:$8 sps:$4 sm:$0xff]   ;;  %v2706_v30 = vld [vmem:[%s4027_s0 + $0x230] ss:$8 sps:$4 sm:$0xff]   ;;  %v2707_v31 = vld [vmem:[%s4027_s0 + $0x44] ss:$8 sps:$4 sm:$0xff]  }
   0xa   :  { %1007 = vmatpush1.bf16.msra.mxu0 %v2675_v3  ;;  %2663 = vmatpush1.bf16.msra.mxu1 %v2675_v3  ;;  %v2709_v32 = vld [vmem:[%s4027_s0 + $0x244] ss:$8 sps:$4 sm:$0xff]   ;;  %v2711_v33 = vld [vmem:[%s4027_s0 + $0x40] ss:$8 sps:$4 sm:$0xff]   ;;  %v2713_v35 = vld [vmem:[%s4027_s0 + $0x54] ss:$8 sps:$4 sm:$0xff]  }
   0xb   :  { %1008 = vmatprep.subr.bf16.mxu0 %v2876_v0  ;;  %2654 = vmatprep.subr.bf16.mxu1 %v2876_v0  ;;  %v2712_v34 = vld [vmem:[%s4027_s0 + $0x240] ss:$8 sps:$4 sm:$0xff]   ;;  %v2715_v36 = vld [vmem:[%s4027_s0 + $0x254] ss:$8 sps:$4 sm:$0xff]   ;;  %v2717_v37 = vld [vmem:[%s4027_s0 + $0x50] ss:$8 sps:$4 sm:$0xff]  }
   0xc   :  { %v2718_v38 = vld [vmem:[%s4027_s0 + $0x250] ss:$8 sps:$4 sm:$0xff]   ;;  %v2719_v39 = vld [vmem:[%s4027_s0 + $0x64] ss:$8 sps:$4 sm:$0xff]   ;;  %v2723_v41 = vld [vmem:[%s4027_s0 + $0x60] ss:$8 sps:$4 sm:$0xff]  }
   0xd   :  { %v2721_v40 = vld [vmem:[%s4027_s0 + $0x264] ss:$8 sps:$4 sm:$0xff]   ;;  %v2724_v42 = vld [vmem:[%s4027_s0 + $0x260] ss:$8 sps:$4 sm:$0xff]   ;;  %v2725_v43 = vld [vmem:[%s4027_s0 + $0x74] ss:$8 sps:$4 sm:$0xff]  }
   0xe   :  { %1009 = vmatpush1.bf16.msra.mxu0 %v2676_v4  ;;  %2664 = vmatpush1.bf16.msra.mxu1 %v2676_v4  ;;  %v2727_v44 = vld [vmem:[%s4027_s0 + $0x274] ss:$8 sps:$4 sm:$0xff]   ;;  %v2729_v45 = vld [vmem:[%s4027_s0 + $0x70] ss:$8 sps:$4 sm:$0xff]   ;;  %v2731_v47 = vld [vmem:[%s4027_s0 + $0x84] ss:$8 sps:$4 sm:$0xff]  }
   0xf   :  { %1010 = vmatprep.subr.bf16.mxu0 %v2876_v0  ;;  %2655 = vmatprep.subr.bf16.mxu1 %v2876_v0  ;;  %v2730_v46 = vld [vmem:[%s4027_s0 + $0x270] ss:$8 sps:$4 sm:$0xff]   ;;  %v2733_v48 = vld [vmem:[%s4027_s0 + $0x284] ss:$8 sps:$4 sm:$0xff]   ;;  %v2735_v49 = vld [vmem:[%s4027_s0 + $0x80] ss:$8 sps:$4 sm:$0xff]  }
  0x10   :  { %v2736_v50 = vld [vmem:[%s4027_s0 + $0x280] ss:$8 sps:$4 sm:$0xff]   ;;  %v2737_v51 = vld [vmem:[%s4027_s0 + $0x94] ss:$8 sps:$4 sm:$0xff]   ;;  %v2741_v53 = vld [vmem:[%s4027_s0 + $0x90] ss:$8 sps:$4 sm:$0xff]  }
  0x11   :  { %v2739_v52 = vld [vmem:[%s4027_s0 + $0x294] ss:$8 sps:$4 sm:$0xff]   ;;  %v2742_v54 = vld [vmem:[%s4027_s0 + $0x290] ss:$8 sps:$4 sm:$0xff]   ;;  %v2743_v55 = vld [vmem:[%s4027_s0 + $0xa4] ss:$8 sps:$4 sm:$0xff]  }
  0x12   :  { %1011 = vmatpush1.bf16.msra.mxu0 %v2677_v7  ;;  %2665 = vmatpush1.bf16.msra.mxu1 %v2677_v7  ;;  %v2745_v56 = vld [vmem:[%s4027_s0 + $0x2a4] ss:$8 sps:$4 sm:$0xff]   ;;  %v2747_v57 = vld [vmem:[%s4027_s0 + $0xa0] ss:$8 sps:$4 sm:$0xff]   ;;  %v2749_v59 = vld [vmem:[%s4027_s0 + $0xb4] ss:$8 sps:$4 sm:$0xff]  }
  0x13   :  { %1012 = vmatprep.subr.bf16.mxu0 %v2876_v0  ;;  %2656 = vmatprep.subr.bf16.mxu1 %v2876_v0  ;;  %v2748_v58 = vld [vmem:[%s4027_s0 + $0x2a0] ss:$8 sps:$4 sm:$0xff]   ;;  %v2751_v60 = vld [vmem:[%s4027_s0 + $0x2b4] ss:$8 sps:$4 sm:$0xff]   ;;  %v2753_v61 = vld [vmem:[%s4027_s0 + $0xb0] ss:$8 sps:$4 sm:$0xff]  }
  0x14   :  { %v2754_v62 = vld [vmem:[%s4027_s0 + $0x2b0] ss:$8 sps:$4 sm:$0xff]   ;;  %v2755_v63 = vld [vmem:[%s4027_s0 + $0xc4] ss:$8 sps:$4 sm:$0xff]   ;;  %v2759_v1 = vld [vmem:[%s4027_s0 + $0xc0] ss:$8 sps:$4 sm:$0xff]  }
  0x15   :  { %v2760_v2 = vld [vmem:[%s4027_s0 + $0x2c0] ss:$8 sps:$4 sm:$0xff]   ;;  %v2761_v3 = vld [vmem:[%s4027_s0 + $0xd4] ss:$8 sps:$4 sm:$0xff]   ;;  %v2765_v5 = vld [vmem:[%s4027_s0 + $0xd0] ss:$8 sps:$4 sm:$0xff]  }
  0x16   :  { %1013 = vmatpush1.bf16.msra.mxu0 %v2678_v8  ;;  %2666 = vmatpush1.bf16.msra.mxu1 %v2678_v8  ;;  %v2763_v4 = vld [vmem:[%s4027_s0 + $0x2d4] ss:$8 sps:$4 sm:$0xff]   ;;  %v2766_v6 = vld [vmem:[%s4027_s0 + $0x2d0] ss:$8 sps:$4 sm:$0xff]   ;;  %v2767_v7 = vld [vmem:[%s4027_s0 + $0xe4] ss:$8 sps:$4 sm:$0xff]  }
  0x17   :  { %1014 = vmatprep.subr.bf16.mxu0 %v2876_v0  ;;  %2657 = vmatprep.subr.bf16.mxu1 %v2876_v0  ;;  %v2769_v8 = vld [vmem:[%s4027_s0 + $0x2e4] ss:$8 sps:$4 sm:$0xff]   ;;  %v2773_v11 = vld [vmem:[%s4027_s0 + $0xf4] ss:$8 sps:$4 sm:$0xff]   ;;  %v2778_v14 = vld [vmem:[%s4027_s0 + $0x2f0] ss:$8 sps:$4 sm:$0xff]  }
  0x18   :  { %v2775_v12 = vld [vmem:[%s4027_s0 + $0x2f4] ss:$8 sps:$4 sm:$0xff]   ;;  %v2779_v15 = vld [vmem:[%s4027_s0 + $0x104] ss:$8 sps:$4 sm:$0xff]  }
  0x1a   :  { %1015 = vmatpush1.bf16.msra.mxu0 %v2679_v9  ;;  %2667 = vmatpush1.bf16.msra.mxu1 %v2679_v9  ;;  %v2771_v9 = vld [vmem:[%s4027_s0 + $0xe0] ss:$8 sps:$4 sm:$0xff]  }
  0x1b   :  { %1016 = vmatprep.subr.bf16.mxu0 %v2876_v0  ;;  %2658 = vmatprep.subr.bf16.mxu1 %v2876_v0 }
  0x1e   :  { %1017 = vmatpush1.bf16.msra.mxu0 %v2680_v10  ;;  %2668 = vmatpush1.bf16.msra.mxu1 %v2680_v10  ;;  %v2772_v10 = vld [vmem:[%s4027_s0 + $0x2e0] ss:$8 sps:$4 sm:$0xff]  }
  0x1f   :  { %1018 = vmatprep.subr.bf16.mxu0 %v2876_v0  ;;  %2659 = vmatprep.subr.bf16.mxu1 %v2876_v0 }
  0x22   :  { %1019 = vmatpush1.bf16.msra.mxu0 %v2681_v13  ;;  %2669 = vmatpush1.bf16.msra.mxu1 %v2681_v13  ;;  %v2777_v13 = vld [vmem:[%s4027_s0 + $0xf0] ss:$8 sps:$4 sm:$0xff]  }
  0x23   :  { %1020 = vmatprep.subr.bf16.mxu0 %v2876_v0  ;;  %2660 = vmatprep.subr.bf16.mxu1 %v2876_v0  ;;  %v2757_v0 = vld [vmem:[%s4027_s0 + $0x2c4] ss:$8 sps:$4 sm:$0xff]  }
  0x26   :  { %1021 = vmatpush1.bf16.msra.mxu0 %v1000_v16  ;;  %2670 = vmatpush1.bf16.msra.mxu1 %v1000_v16  ;;  %v2781_v16 = vld [vmem:[%s4027_s0 + $0x304] ss:$8 sps:$4 sm:$0xff]  }
  0x29   :  { %1035 = vmatmul.mubr.bf16.vlgmr.msra.gmra.mrb[0].mxu0 %v2683_v17  ;;  %1291 = vmatmul.mubr.bf16.vlgmr.msra.gmra.mrb[0].mxu1 %v2686_v18  ;;  %v2783_v17 = vld [vmem:[%s4027_s0 + $0x100] ss:$8 sps:$4 sm:$0xff]  }
  0x2a   :  { %2332 = vmatprep.mubr.msk.bf16.mxu0 %vm802_vm0, %v2689_v19  ;;  %2364 = vmatprep.mubr.msk.bf16.mxu1 %vm802_vm0, %v2691_v20  ;;  %v2784_v18 = vld [vmem:[%s4027_s0 + $0x300] ss:$8 sps:$4 sm:$0xff]   ;;  %v2785_v19 = vld [vmem:[%s4027_s0 + $0x114] ss:$8 sps:$4 sm:$0xff]  }
  0x2b   :  { %v2787_v20 = vld [vmem:[%s4027_s0 + $0x314] ss:$8 sps:$4 sm:$0xff]  }
  0x31   :  { %1043 = vmatmul.mubr.bf16.gmra.mrb[4].mxu0 %v2693_v21  ;;  %1299 = vmatmul.mubr.bf16.gmra.mrb[4].mxu1 %v2694_v22  ;;  %v2789_v21 = vld [vmem:[%s4027_s0 + $0x110] ss:$8 sps:$4 sm:$0xff]  }
  0x32   :  { %2333 = vmatprep.mubr.msk.bf16.mxu0 %vm802_vm0, %v2695_v23  ;;  %2365 = vmatprep.mubr.msk.bf16.mxu1 %vm802_vm0, %v2697_v24  ;;  %v2790_v22 = vld [vmem:[%s4027_s0 + $0x310] ss:$8 sps:$4 sm:$0xff]   ;;  %v2791_v23 = vld [vmem:[%s4027_s0 + $0x124] ss:$8 sps:$4 sm:$0xff]  }
  0x33   :  { %v2793_v24 = vld [vmem:[%s4027_s0 + $0x324] ss:$8 sps:$4 sm:$0xff]  }
  0x39   :  { %1051 = vmatmul.mubr.bf16.gmra.mrb[8].mxu0 %v2699_v25  ;;  %1307 = vmatmul.mubr.bf16.gmra.mrb[8].mxu1 %v2700_v26  ;;  %v2795_v25 = vld [vmem:[%s4027_s0 + $0x120] ss:$8 sps:$4 sm:$0xff]  }
  0x3a   :  { %2334 = vmatprep.mubr.msk.bf16.mxu0 %vm802_vm0, %v2701_v27  ;;  %2366 = vmatprep.mubr.msk.bf16.mxu1 %vm802_vm0, %v2703_v28  ;;  %v2796_v26 = vld [vmem:[%s4027_s0 + $0x320] ss:$8 sps:$4 sm:$0xff]   ;;  %v2797_v27 = vld [vmem:[%s4027_s0 + $0x134] ss:$8 sps:$4 sm:$0xff]  }
  0x3b   :  { %v2799_v28 = vld [vmem:[%s4027_s0 + $0x334] ss:$8 sps:$4 sm:$0xff]  }
  0x41   :  { %1059 = vmatmul.mubr.bf16.gmra.mrb[12].mxu0 %v2705_v29  ;;  %1315 = vmatmul.mubr.bf16.gmra.mrb[12].mxu1 %v2706_v30  ;;  %v2801_v29 = vld [vmem:[%s4027_s0 + $0x130] ss:$8 sps:$4 sm:$0xff]  }
  0x42   :  { %2335 = vmatprep.mubr.msk.bf16.mxu0 %vm802_vm0, %v2707_v31  ;;  %2367 = vmatprep.mubr.msk.bf16.mxu1 %vm802_vm0, %v2709_v32  ;;  %v2802_v30 = vld [vmem:[%s4027_s0 + $0x330] ss:$8 sps:$4 sm:$0xff]   ;;  %v2803_v31 = vld [vmem:[%s4027_s0 + $0x144] ss:$8 sps:$4 sm:$0xff]  }
  0x43   :  { %v2805_v32 = vld [vmem:[%s4027_s0 + $0x344] ss:$8 sps:$4 sm:$0xff]  }
  0x49   :  { %1067 = vmatmul.mubr.bf16.gmra.mrb[16].mxu0 %v2711_v33  ;;  %1323 = vmatmul.mubr.bf16.gmra.mrb[16].mxu1 %v2712_v34  ;;  %v2807_v33 = vld [vmem:[%s4027_s0 + $0x140] ss:$8 sps:$4 sm:$0xff]  }
  0x4a   :  { %2336 = vmatprep.mubr.msk.bf16.mxu0 %vm802_vm0, %v2713_v35  ;;  %2368 = vmatprep.mubr.msk.bf16.mxu1 %vm802_vm0, %v2715_v36  ;;  %v2808_v34 = vld [vmem:[%s4027_s0 + $0x340] ss:$8 sps:$4 sm:$0xff]   ;;  %v2809_v35 = vld [vmem:[%s4027_s0 + $0x154] ss:$8 sps:$4 sm:$0xff]  }
  0x4b   :  { %v2811_v36 = vld [vmem:[%s4027_s0 + $0x354] ss:$8 sps:$4 sm:$0xff]  }
  0x51   :  { %1075 = vmatmul.mubr.bf16.gmra.mrb[20].mxu0 %v2717_v37  ;;  %1331 = vmatmul.mubr.bf16.gmra.mrb[20].mxu1 %v2718_v38  ;;  %v2813_v37 = vld [vmem:[%s4027_s0 + $0x150] ss:$8 sps:$4 sm:$0xff]  }
  0x52   :  { %2337 = vmatprep.mubr.msk.bf16.mxu0 %vm802_vm0, %v2719_v39  ;;  %2369 = vmatprep.mubr.msk.bf16.mxu1 %vm802_vm0, %v2721_v40  ;;  %v2814_v38 = vld [vmem:[%s4027_s0 + $0x350] ss:$8 sps:$4 sm:$0xff]   ;;  %v2815_v39 = vld [vmem:[%s4027_s0 + $0x164] ss:$8 sps:$4 sm:$0xff]  }
  0x53   :  { %v2817_v40 = vld [vmem:[%s4027_s0 + $0x364] ss:$8 sps:$4 sm:$0xff]  }
  0x59   :  { %1083 = vmatmul.mubr.bf16.gmra.mrb[24].mxu0 %v2723_v41  ;;  %1339 = vmatmul.mubr.bf16.gmra.mrb[24].mxu1 %v2724_v42  ;;  %v2819_v41 = vld [vmem:[%s4027_s0 + $0x160] ss:$8 sps:$4 sm:$0xff]  }
  0x5a   :  { %2338 = vmatprep.mubr.msk.bf16.mxu0 %vm802_vm0, %v2725_v43  ;;  %2370 = vmatprep.mubr.msk.bf16.mxu1 %vm802_vm0, %v2727_v44  ;;  %v2820_v42 = vld [vmem:[%s4027_s0 + $0x360] ss:$8 sps:$4 sm:$0xff]   ;;  %v2821_v43 = vld [vmem:[%s4027_s0 + $0x174] ss:$8 sps:$4 sm:$0xff]  }
  0x5b   :  { %v2823_v44 = vld [vmem:[%s4027_s0 + $0x374] ss:$8 sps:$4 sm:$0xff]  }
  0x61   :  { %1091 = vmatmul.mubr.bf16.gmra.mrb[28].mxu0 %v2729_v45  ;;  %1347 = vmatmul.mubr.bf16.gmra.mrb[28].mxu1 %v2730_v46  ;;  %v2825_v45 = vld [vmem:[%s4027_s0 + $0x170] ss:$8 sps:$4 sm:$0xff]  }
  0x62   :  { %2339 = vmatprep.mubr.msk.bf16.mxu0 %vm802_vm0, %v2731_v47  ;;  %2371 = vmatprep.mubr.msk.bf16.mxu1 %vm802_vm0, %v2733_v48  ;;  %v2826_v46 = vld [vmem:[%s4027_s0 + $0x370] ss:$8 sps:$4 sm:$0xff]   ;;  %v2827_v47 = vld [vmem:[%s4027_s0 + $0x184] ss:$8 sps:$4 sm:$0xff]  }
  0x63   :  { %v2829_v48 = vld [vmem:[%s4027_s0 + $0x384] ss:$8 sps:$4 sm:$0xff]  }
  0x69   :  { %1099 = vmatmul.mubr.bf16.gmra.mrb[32].mxu0 %v2735_v49  ;;  %1355 = vmatmul.mubr.bf16.gmra.mrb[32].mxu1 %v2736_v50  ;;  %v2831_v49 = vld [vmem:[%s4027_s0 + $0x180] ss:$8 sps:$4 sm:$0xff]  }
  0x6a   :  { %2340 = vmatprep.mubr.msk.bf16.mxu0 %vm802_vm0, %v2737_v51  ;;  %2372 = vmatprep.mubr.msk.bf16.mxu1 %vm802_vm0, %v2739_v52  ;;  %v2832_v50 = vld [vmem:[%s4027_s0 + $0x380] ss:$8 sps:$4 sm:$0xff]   ;;  %v2833_v51 = vld [vmem:[%s4027_s0 + $0x194] ss:$8 sps:$4 sm:$0xff]  }
  0x6b   :  { %v2835_v52 = vld [vmem:[%s4027_s0 + $0x394] ss:$8 sps:$4 sm:$0xff]  }
  0x71   :  { %1107 = vmatmul.mubr.bf16.gmra.mrb[36].mxu0 %v2741_v53  ;;  %1363 = vmatmul.mubr.bf16.gmra.mrb[36].mxu1 %v2742_v54  ;;  %v2837_v53 = vld [vmem:[%s4027_s0 + $0x190] ss:$8 sps:$4 sm:$0xff]  }
  0x72   :  { %2341 = vmatprep.mubr.msk.bf16.mxu0 %vm802_vm0, %v2743_v55  ;;  %2373 = vmatprep.mubr.msk.bf16.mxu1 %vm802_vm0, %v2745_v56  ;;  %v2838_v54 = vld [vmem:[%s4027_s0 + $0x390] ss:$8 sps:$4 sm:$0xff]   ;;  %v2839_v55 = vld [vmem:[%s4027_s0 + $0x1a4] ss:$8 sps:$4 sm:$0xff]  }
  0x73   :  { %v2841_v56 = vld [vmem:[%s4027_s0 + $0x3a4] ss:$8 sps:$4 sm:$0xff]  }
  0x79   :  { %1115 = vmatmul.mubr.bf16.gmra.mrb[40].mxu0 %v2747_v57  ;;  %1371 = vmatmul.mubr.bf16.gmra.mrb[40].mxu1 %v2748_v58  ;;  %v2843_v57 = vld [vmem:[%s4027_s0 + $0x1a0] ss:$8 sps:$4 sm:$0xff]  }
  0x7a   :  { %2342 = vmatprep.mubr.msk.bf16.mxu0 %vm802_vm0, %v2749_v59  ;;  %2374 = vmatprep.mubr.msk.bf16.mxu1 %vm802_vm0, %v2751_v60  ;;  %v2844_v58 = vld [vmem:[%s4027_s0 + $0x3a0] ss:$8 sps:$4 sm:$0xff]   ;;  %v2845_v59 = vld [vmem:[%s4027_s0 + $0x1b4] ss:$8 sps:$4 sm:$0xff]  }
  0x7b   :  { %v2847_v60 = vld [vmem:[%s4027_s0 + $0x3b4] ss:$8 sps:$4 sm:$0xff]  }
  0x81   :  { %1123 = vmatmul.mubr.bf16.gmra.mrb[44].mxu0 %v2753_v61  ;;  %1379 = vmatmul.mubr.bf16.gmra.mrb[44].mxu1 %v2754_v62  ;;  %v3315_v61 = vld [vmem:[%s4028_s2] ss:$0 sm:$0xff] }
  0x82   :  { %2343 = vmatprep.mubr.msk.bf16.mxu0 %vm802_vm0, %v2755_v63  ;;  %2375 = vmatprep.mubr.msk.bf16.mxu1 %vm802_vm0, %v2757_v0 }
  0x89   :  { %1131 = vmatmul.mubr.bf16.gmra.mrb[48].mxu0 %v2759_v1  ;;  %1387 = vmatmul.mubr.bf16.gmra.mrb[48].mxu1 %v2760_v2 }
  0x8a   :  { %2344 = vmatprep.mubr.msk.bf16.mxu0 %vm802_vm0, %v2761_v3  ;;  %2376 = vmatprep.mubr.msk.bf16.mxu1 %vm802_vm0, %v2763_v4  ;;  %v2849_v4 = vld [vmem:[%s4027_s0 + $0x1b0] ss:$8 sps:$4 sm:$0xff]  }
  0x91   :  { %1139 = vmatmul.mubr.bf16.gmra.mrb[52].mxu0 %v2765_v5  ;;  %1395 = vmatmul.mubr.bf16.gmra.mrb[52].mxu1 %v2766_v6  ;;  %v2850_v5 = vld [vmem:[%s4027_s0 + $0x3b0] ss:$8 sps:$4 sm:$0xff]  }
  0x92   :  { %2345 = vmatprep.mubr.msk.bf16.mxu0 %vm802_vm0, %v2767_v7  ;;  %2377 = vmatprep.mubr.msk.bf16.mxu1 %vm802_vm0, %v2769_v8  ;;  %v2851_v8 = vld [vmem:[%s4027_s0 + $0x1c4] ss:$8 sps:$4 sm:$0xff]  }
  0x99   :  { %1147 = vmatmul.mubr.bf16.gmra.mrb[56].mxu0 %v2771_v9  ;;  %1403 = vmatmul.mubr.bf16.gmra.mrb[56].mxu1 %v2772_v10  ;;  %v2853_v9 = vld [vmem:[%s4027_s0 + $0x3c4] ss:$8 sps:$4 sm:$0xff]  }
  0x9a   :  { %2346 = vmatprep.mubr.msk.bf16.mxu0 %vm802_vm0, %v2773_v11  ;;  %2378 = vmatprep.mubr.msk.bf16.mxu1 %vm802_vm0, %v2775_v12 }
  0xa1   :  { %1155 = vmatmul.mubr.bf16.gmra.mrb[60].mxu0 %v2777_v13  ;;  %1411 = vmatmul.mubr.bf16.gmra.mrb[60].mxu1 %v2778_v14 }
  0xa2   :  { %2347 = vmatprep.mubr.msk.bf16.mxu0 %vm802_vm0, %v2779_v15  ;;  %2379 = vmatprep.mubr.msk.bf16.mxu1 %vm802_vm0, %v2781_v16 }
  0xa9   :  { %1163 = vmatmul.mubr.bf16.gmra.mrb[64].mxu0 %v2783_v17  ;;  %1419 = vmatmul.mubr.bf16.gmra.mrb[64].mxu1 %v2784_v18 }
  0xaa   :  { %2348 = vmatprep.mubr.msk.bf16.mxu0 %vm802_vm0, %v2785_v19  ;;  %2380 = vmatprep.mubr.msk.bf16.mxu1 %vm802_vm0, %v2787_v20 }
  0xb1   :  { %1171 = vmatmul.mubr.bf16.gmra.mrb[68].mxu0 %v2789_v21  ;;  %1427 = vmatmul.mubr.bf16.gmra.mrb[68].mxu1 %v2790_v22 }
  0xb2   :  { %2349 = vmatprep.mubr.msk.bf16.mxu0 %vm802_vm0, %v2791_v23  ;;  %2381 = vmatprep.mubr.msk.bf16.mxu1 %vm802_vm0, %v2793_v24  ;;  %v2855_v24 = vld [vmem:[%s4027_s0 + $0x1c0] ss:$8 sps:$4 sm:$0xff]  }
  0xb9   :  { %1179 = vmatmul.mubr.bf16.gmra.mrb[72].mxu0 %v2795_v25  ;;  %1435 = vmatmul.mubr.bf16.gmra.mrb[72].mxu1 %v2796_v26  ;;  %v2856_v25 = vld [vmem:[%s4027_s0 + $0x3c0] ss:$8 sps:$4 sm:$0xff]  }
  0xba   :  { %2350 = vmatprep.mubr.msk.bf16.mxu0 %vm802_vm0, %v2797_v27  ;;  %2382 = vmatprep.mubr.msk.bf16.mxu1 %vm802_vm0, %v2799_v28  ;;  %v2857_v28 = vld [vmem:[%s4027_s0 + $0x1d4] ss:$8 sps:$4 sm:$0xff]  }
  0xc1   :  { %1187 = vmatmul.mubr.bf16.gmra.mrb[76].mxu0 %v2801_v29  ;;  %1443 = vmatmul.mubr.bf16.gmra.mrb[76].mxu1 %v2802_v30  ;;  %v2859_v29 = vld [vmem:[%s4027_s0 + $0x3d4] ss:$8 sps:$4 sm:$0xff]  }
  0xc2   :  { %2351 = vmatprep.mubr.msk.bf16.mxu0 %vm802_vm0, %v2803_v31  ;;  %2383 = vmatprep.mubr.msk.bf16.mxu1 %vm802_vm0, %v2805_v32 }
  0xc9   :  { %1195 = vmatmul.mubr.bf16.gmra.mrb[80].mxu0 %v2807_v33  ;;  %1451 = vmatmul.mubr.bf16.gmra.mrb[80].mxu1 %v2808_v34 }
  0xca   :  { %2352 = vmatprep.mubr.msk.bf16.mxu0 %vm802_vm0, %v2809_v35  ;;  %2384 = vmatprep.mubr.msk.bf16.mxu1 %vm802_vm0, %v2811_v36 }
  0xd1   :  { %1203 = vmatmul.mubr.bf16.gmra.mrb[84].mxu0 %v2813_v37  ;;  %1459 = vmatmul.mubr.bf16.gmra.mrb[84].mxu1 %v2814_v38 }
  0xd2   :  { %2353 = vmatprep.mubr.msk.bf16.mxu0 %vm802_vm0, %v2815_v39  ;;  %2385 = vmatprep.mubr.msk.bf16.mxu1 %vm802_vm0, %v2817_v40 }
  0xd9   :  { %1211 = vmatmul.mubr.bf16.gmra.mrb[88].mxu0 %v2819_v41  ;;  %1467 = vmatmul.mubr.bf16.gmra.mrb[88].mxu1 %v2820_v42 }
  0xda   :  { %2354 = vmatprep.mubr.msk.bf16.mxu0 %vm802_vm0, %v2821_v43  ;;  %2386 = vmatprep.mubr.msk.bf16.mxu1 %vm802_vm0, %v2823_v44  ;;  %v2861_v44 = vld [vmem:[%s4027_s0 + $0x1d0] ss:$8 sps:$4 sm:$0xff]  }
  0xe1   :  { %1219 = vmatmul.mubr.bf16.gmra.mrb[92].mxu0 %v2825_v45  ;;  %1475 = vmatmul.mubr.bf16.gmra.mrb[92].mxu1 %v2826_v46  ;;  %v2862_v45 = vld [vmem:[%s4027_s0 + $0x3d0] ss:$8 sps:$4 sm:$0xff]  }
  0xe2   :  { %2355 = vmatprep.mubr.msk.bf16.mxu0 %vm802_vm0, %v2827_v47  ;;  %2387 = vmatprep.mubr.msk.bf16.mxu1 %vm802_vm0, %v2829_v48  ;;  %v2863_v48 = vld [vmem:[%s4027_s0 + $0x1e4] ss:$8 sps:$4 sm:$0xff]  }
  0xe9   :  { %1227 = vmatmul.mubr.bf16.gmra.mrb[96].mxu0 %v2831_v49  ;;  %1483 = vmatmul.mubr.bf16.gmra.mrb[96].mxu1 %v2832_v50  ;;  %v2865_v49 = vld [vmem:[%s4027_s0 + $0x3e4] ss:$8 sps:$4 sm:$0xff]  }
  0xea   :  { %2356 = vmatprep.mubr.msk.bf16.mxu0 %vm802_vm0, %v2833_v51  ;;  %2388 = vmatprep.mubr.msk.bf16.mxu1 %vm802_vm0, %v2835_v52 }
  0xf1   :  { %1235 = vmatmul.mubr.bf16.gmra.mrb[100].mxu0 %v2837_v53  ;;  %1491 = vmatmul.mubr.bf16.gmra.mrb[100].mxu1 %v2838_v54 }
  0xf2   :  { %2357 = vmatprep.mubr.msk.bf16.mxu0 %vm802_vm0, %v2839_v55  ;;  %2389 = vmatprep.mubr.msk.bf16.mxu1 %vm802_vm0, %v2841_v56 }
  0xf9   :  { %1243 = vmatmul.mubr.bf16.gmra.mrb[104].mxu0 %v2843_v57  ;;  %1499 = vmatmul.mubr.bf16.gmra.mrb[104].mxu1 %v2844_v58 }
  0xfa   :  { %2358 = vmatprep.mubr.msk.bf16.mxu0 %vm802_vm0, %v2845_v59  ;;  %2390 = vmatprep.mubr.msk.bf16.mxu1 %vm802_vm0, %v2847_v60 }
  0xfc   :  { %v1036_v62 = vpop.f32.mrb[0].mxu0  ;;  %v1292_v63 = vpop.f32.mrb[0].mxu1 }
  0xfd   :  { %v1037_v0 = vadd.f32 %v3315_v61, %v1036_v62  ;;  %v1293_v1 = vadd.f32 %v3315_v61, %v1292_v63  ;;  %v1038_v2 = vpop.f32.mrb[1].mxu0  ;;  %v1294_v3 = vpop.f32.mrb[1].mxu1 }
  0xfe   :  { %v1039_v6 = vpop.f32.mrb[2].mxu0  ;;  %v1295_v7 = vpop.f32.mrb[2].mxu1  ;;  %v2868_v2 = vld [vmem:[%s4027_s0 + $0x3e0] ss:$8 sps:$4 sm:$0xff]  }
  0xff   :  { %v2523_v10 = vpack.c.bf16 %v1037_v0, %v1037_v0  ;;  %v2587_v11 = vpack.c.bf16 %v1293_v1, %v1293_v1  ;;  %v1040_v12 = vadd.f32 %v3315_v61, %v1039_v6  ;;  %v1296_v13 = vadd.f32 %v3315_v61, %v1295_v7  ;;  %v1041_v14 = vpop.f32.mrb[3].mxu0  ;;  %v1297_v15 = vpop.f32.mrb[3].mxu1  ;;  %v2867_v1 = vld [vmem:[%s4027_s0 + $0x1e0] ss:$8 sps:$4 sm:$0xff]   ;;  %v2871_v6 = vld [vmem:[%s4027_s0 + $0x3f4] ss:$8 sps:$4 sm:$0xff]  }
 0x101   :  { %2060 = vst.msk [vmem:[%s4029_s3] sm:$0xf] %vm2059_vm3, %v2523_v10  ;;  %2124 = vst.msk [vmem:[%s4029_s3 + $0x100] sm:$0xf] %vm2059_vm3, %v2587_v11  ;;  %v2524_v16 = vpack.c.bf16 %v1040_v12, %v1040_v12  ;;  %v2588_v17 = vpack.c.bf16 %v1296_v13, %v1296_v13  ;;  %1251 = vmatmul.mubr.bf16.gmra.mrb[108].mxu0 %v2849_v4  ;;  %1507 = vmatmul.mubr.bf16.gmra.mrb[108].mxu1 %v2850_v5  ;;  %v2869_v5 = vld [vmem:[%s4027_s0 + $0x1f4] ss:$8 sps:$4 sm:$0xff]  }
 0x102   :  { %2359 = vmatprep.mubr.msk.bf16.mxu0 %vm802_vm0, %v2851_v8  ;;  %2391 = vmatprep.mubr.msk.bf16.mxu1 %vm802_vm0, %v2853_v9 }
 0x103   :  { %2061 = vst.msk [vmem:[%s4029_s3 + $0x4] sm:$0xf] %vm2059_vm3, %v2524_v16  ;;  %2125 = vst.msk [vmem:[%s4029_s3 + $0x104] sm:$0xf] %vm2059_vm3, %v2588_v17 }
 0x104   :  { %v1044_v18 = vpop.f32.mrb[4].mxu0  ;;  %v1300_v19 = vpop.f32.mrb[4].mxu1 }
 0x105   :  { %v1045_v20 = vadd.f32 %v3315_v61, %v1044_v18  ;;  %v1301_v21 = vadd.f32 %v3315_v61, %v1300_v19  ;;  %v1046_v22 = vpop.f32.mrb[5].mxu0  ;;  %v1302_v23 = vpop.f32.mrb[5].mxu1 }
 0x106   :  { %v1047_v26 = vpop.f32.mrb[6].mxu0  ;;  %v1303_v27 = vpop.f32.mrb[6].mxu1  ;;  %v2874_v22 = vld [vmem:[%s4027_s0 + $0x3f0] ss:$8 sps:$4 sm:$0xff]  }
 0x107   :  { %v2525_v30 = vpack.c.bf16 %v1045_v20, %v1045_v20  ;;  %v2589_v31 = vpack.c.bf16 %v1301_v21, %v1301_v21  ;;  %v1048_v32 = vadd.f32 %v3315_v61, %v1047_v26  ;;  %v1304_v33 = vadd.f32 %v3315_v61, %v1303_v27  ;;  %v1049_v34 = vpop.f32.mrb[7].mxu0  ;;  %v1305_v35 = vpop.f32.mrb[7].mxu1  ;;  %v2873_v21 = vld [vmem:[%s4027_s0 + $0x1f0] ss:$8 sps:$4 sm:$0xff]  }
 0x109   :  { %2062 = vst.msk [vmem:[%s4029_s3 + $0x8] sm:$0xf] %vm2059_vm3, %v2525_v30  ;;  %2126 = vst.msk [vmem:[%s4029_s3 + $0x108] sm:$0xf] %vm2059_vm3, %v2589_v31  ;;  %v2526_v36 = vpack.c.bf16 %v1048_v32, %v1048_v32  ;;  %v2590_v37 = vpack.c.bf16 %v1304_v33, %v1304_v33  ;;  %1259 = vmatmul.mubr.bf16.gmra.mrb[112].mxu0 %v2855_v24  ;;  %1515 = vmatmul.mubr.bf16.gmra.mrb[112].mxu1 %v2856_v25 }
 0x10a   :  { %2360 = vmatprep.mubr.msk.bf16.mxu0 %vm802_vm0, %v2857_v28  ;;  %2392 = vmatprep.mubr.msk.bf16.mxu1 %vm802_vm0, %v2859_v29 }
 0x10b   :  { %2063 = vst.msk [vmem:[%s4029_s3 + $0xc] sm:$0xf] %vm2059_vm3, %v2526_v36  ;;  %2127 = vst.msk [vmem:[%s4029_s3 + $0x10c] sm:$0xf] %vm2059_vm3, %v2590_v37 }
 0x10c   :  { %v1052_v38 = vpop.f32.mrb[8].mxu0  ;;  %v1308_v39 = vpop.f32.mrb[8].mxu1 }
 0x10d   :  { %v1053_v40 = vadd.f32 %v3315_v61, %v1052_v38  ;;  %v1309_v41 = vadd.f32 %v3315_v61, %v1308_v39  ;;  %v1054_v42 = vpop.f32.mrb[9].mxu0  ;;  %v1310_v43 = vpop.f32.mrb[9].mxu1 }
 0x10e   :  { %v1055_v46 = vpop.f32.mrb[10].mxu0  ;;  %v1311_v47 = vpop.f32.mrb[10].mxu1 }
 0x10f   :  { %v2527_v50 = vpack.c.bf16 %v1053_v40, %v1053_v40  ;;  %v2591_v51 = vpack.c.bf16 %v1309_v41, %v1309_v41  ;;  %v1056_v52 = vadd.f32 %v3315_v61, %v1055_v46  ;;  %v1312_v53 = vadd.f32 %v3315_v61, %v1311_v47  ;;  %v1057_v54 = vpop.f32.mrb[11].mxu0  ;;  %v1313_v55 = vpop.f32.mrb[11].mxu1 }
 0x111   :  { %2064 = vst.msk [vmem:[%s4029_s3 + $0x10] sm:$0xf] %vm2059_vm3, %v2527_v50  ;;  %2128 = vst.msk [vmem:[%s4029_s3 + $0x110] sm:$0xf] %vm2059_vm3, %v2591_v51  ;;  %v2528_v56 = vpack.c.bf16 %v1056_v52, %v1056_v52  ;;  %v2592_v57 = vpack.c.bf16 %v1312_v53, %v1312_v53  ;;  %1267 = vmatmul.mubr.bf16.gmra.mrb[116].mxu0 %v2861_v44  ;;  %1523 = vmatmul.mubr.bf16.gmra.mrb[116].mxu1 %v2862_v45 }
 0x112   :  { %2361 = vmatprep.mubr.msk.bf16.mxu0 %vm802_vm0, %v2863_v48  ;;  %2393 = vmatprep.mubr.msk.bf16.mxu1 %vm802_vm0, %v2865_v49 }
 0x113   :  { %2065 = vst.msk [vmem:[%s4029_s3 + $0x14] sm:$0xf] %vm2059_vm3, %v2528_v56  ;;  %2129 = vst.msk [vmem:[%s4029_s3 + $0x114] sm:$0xf] %vm2059_vm3, %v2592_v57 }
 0x114   :  { %v1060_v58 = vpop.f32.mrb[12].mxu0  ;;  %v1316_v59 = vpop.f32.mrb[12].mxu1 }
 0x115   :  { %v1061_v60 = vadd.f32 %v3315_v61, %v1060_v58  ;;  %v1317_v62 = vadd.f32 %v3315_v61, %v1316_v59  ;;  %v1062_v63 = vpop.f32.mrb[13].mxu0  ;;  %v1318_v0 = vpop.f32.mrb[13].mxu1 }
 0x116   :  { %v1063_v3 = vpop.f32.mrb[14].mxu0  ;;  %v1319_v4 = vpop.f32.mrb[14].mxu1 }
 0x117   :  { %v2529_v7 = vpack.c.bf16 %v1061_v60, %v1061_v60  ;;  %v2593_v8 = vpack.c.bf16 %v1317_v62, %v1317_v62  ;;  %v1064_v9 = vadd.f32 %v3315_v61, %v1063_v3  ;;  %v1320_v10 = vadd.f32 %v3315_v61, %v1319_v4  ;;  %v1065_v11 = vpop.f32.mrb[15].mxu0  ;;  %v1321_v12 = vpop.f32.mrb[15].mxu1 }
 0x119   :  { %2066 = vst.msk [vmem:[%s4029_s3 + $0x18] sm:$0xf] %vm2059_vm3, %v2529_v7  ;;  %2130 = vst.msk [vmem:[%s4029_s3 + $0x118] sm:$0xf] %vm2059_vm3, %v2593_v8  ;;  %v2530_v13 = vpack.c.bf16 %v1064_v9, %v1064_v9  ;;  %v2594_v14 = vpack.c.bf16 %v1320_v10, %v1320_v10  ;;  %1275 = vmatmul.mubr.bf16.gmra.mrb[120].mxu0 %v2867_v1  ;;  %1531 = vmatmul.mubr.bf16.gmra.mrb[120].mxu1 %v2868_v2 }
 0x11a   :  { %2362 = vmatprep.mubr.msk.bf16.mxu0 %vm802_vm0, %v2869_v5  ;;  %2394 = vmatprep.mubr.msk.bf16.mxu1 %vm802_vm0, %v2871_v6 }
 0x11b   :  { %2067 = vst.msk [vmem:[%s4029_s3 + $0x1c] sm:$0xf] %vm2059_vm3, %v2530_v13  ;;  %2131 = vst.msk [vmem:[%s4029_s3 + $0x11c] sm:$0xf] %vm2059_vm3, %v2594_v14 }
 0x11c   :  { %v1068_v15 = vpop.f32.mrb[16].mxu0  ;;  %v1324_v16 = vpop.f32.mrb[16].mxu1 }
 0x11d   :  { %v1069_v17 = vadd.f32 %v3315_v61, %v1068_v15  ;;  %v1325_v18 = vadd.f32 %v3315_v61, %v1324_v16  ;;  %v1070_v19 = vpop.f32.mrb[17].mxu0  ;;  %v1326_v20 = vpop.f32.mrb[17].mxu1 }
 0x11e   :  { %v1071_v23 = vpop.f32.mrb[18].mxu0  ;;  %v1327_v24 = vpop.f32.mrb[18].mxu1 }
 0x11f   :  { %v2531_v25 = vpack.c.bf16 %v1069_v17, %v1069_v17  ;;  %v2595_v26 = vpack.c.bf16 %v1325_v18, %v1325_v18  ;;  %v1072_v27 = vadd.f32 %v3315_v61, %v1071_v23  ;;  %v1328_v28 = vadd.f32 %v3315_v61, %v1327_v24  ;;  %v1073_v29 = vpop.f32.mrb[19].mxu0  ;;  %v1329_v30 = vpop.f32.mrb[19].mxu1 }
 0x121   :  { %2068 = vst.msk [vmem:[%s4029_s3 + $0x20] sm:$0xf] %vm2059_vm3, %v2531_v25  ;;  %2132 = vst.msk [vmem:[%s4029_s3 + $0x120] sm:$0xf] %vm2059_vm3, %v2595_v26  ;;  %v2532_v31 = vpack.c.bf16 %v1072_v27, %v1072_v27  ;;  %v2596_v32 = vpack.c.bf16 %v1328_v28, %v1328_v28  ;;  %1283 = vmatmul.mubr.bf16.gmra.mrb[124].mxu0 %v2873_v21  ;;  %1539 = vmatmul.mubr.bf16.gmra.mrb[124].mxu1 %v2874_v22 }
 0x123   :  { %2069 = vst.msk [vmem:[%s4029_s3 + $0x24] sm:$0xf] %vm2059_vm3, %v2532_v31  ;;  %2133 = vst.msk [vmem:[%s4029_s3 + $0x124] sm:$0xf] %vm2059_vm3, %v2596_v32 }
 0x124   :  { %v1076_v33 = vpop.f32.mrb[20].mxu0  ;;  %v1332_v34 = vpop.f32.mrb[20].mxu1 }
 0x125   :  { %v1077_v35 = vadd.f32 %v3315_v61, %v1076_v33  ;;  %v1333_v36 = vadd.f32 %v3315_v61, %v1332_v34  ;;  %v1078_v37 = vpop.f32.mrb[21].mxu0  ;;  %v1334_v38 = vpop.f32.mrb[21].mxu1 }
 0x126   :  { %v1079_v39 = vpop.f32.mrb[22].mxu0  ;;  %v1335_v40 = vpop.f32.mrb[22].mxu1 }
 0x127   :  { %v2533_v41 = vpack.c.bf16 %v1077_v35, %v1077_v35  ;;  %v2597_v42 = vpack.c.bf16 %v1333_v36, %v1333_v36  ;;  %v1080_v43 = vadd.f32 %v3315_v61, %v1079_v39  ;;  %v1336_v44 = vadd.f32 %v3315_v61, %v1335_v40  ;;  %v1081_v45 = vpop.f32.mrb[23].mxu0  ;;  %v1337_v46 = vpop.f32.mrb[23].mxu1 }
 0x129   :  { %2070 = vst.msk [vmem:[%s4029_s3 + $0x28] sm:$0xf] %vm2059_vm3, %v2533_v41  ;;  %2134 = vst.msk [vmem:[%s4029_s3 + $0x128] sm:$0xf] %vm2059_vm3, %v2597_v42  ;;  %v2534_v47 = vpack.c.bf16 %v1080_v43, %v1080_v43  ;;  %v2598_v48 = vpack.c.bf16 %v1336_v44, %v1336_v44 }
 0x12b   :  { %2071 = vst.msk [vmem:[%s4029_s3 + $0x2c] sm:$0xf] %vm2059_vm3, %v2534_v47  ;;  %2135 = vst.msk [vmem:[%s4029_s3 + $0x12c] sm:$0xf] %vm2059_vm3, %v2598_v48 }
 0x12c   :  { %v1084_v49 = vpop.f32.mrb[24].mxu0  ;;  %v1340_v50 = vpop.f32.mrb[24].mxu1 }
 0x12d   :  { %v1085_v51 = vadd.f32 %v3315_v61, %v1084_v49  ;;  %v1341_v52 = vadd.f32 %v3315_v61, %v1340_v50  ;;  %v1086_v53 = vpop.f32.mrb[25].mxu0  ;;  %v1342_v54 = vpop.f32.mrb[25].mxu1 }
 0x12e   :  { %v1087_v55 = vpop.f32.mrb[26].mxu0  ;;  %v1343_v56 = vpop.f32.mrb[26].mxu1 }
 0x12f   :  { %v2535_v57 = vpack.c.bf16 %v1085_v51, %v1085_v51  ;;  %v2599_v58 = vpack.c.bf16 %v1341_v52, %v1341_v52  ;;  %v1088_v59 = vadd.f32 %v3315_v61, %v1087_v55  ;;  %v1344_v60 = vadd.f32 %v3315_v61, %v1343_v56  ;;  %v1089_v62 = vpop.f32.mrb[27].mxu0  ;;  %v1345_v63 = vpop.f32.mrb[27].mxu1 }
 0x131   :  { %2072 = vst.msk [vmem:[%s4029_s3 + $0x30] sm:$0xf] %vm2059_vm3, %v2535_v57  ;;  %2136 = vst.msk [vmem:[%s4029_s3 + $0x130] sm:$0xf] %vm2059_vm3, %v2599_v58  ;;  %v2536_v0 = vpack.c.bf16 %v1088_v59, %v1088_v59  ;;  %v2600_v1 = vpack.c.bf16 %v1344_v60, %v1344_v60 }
 0x133   :  { %2073 = vst.msk [vmem:[%s4029_s3 + $0x34] sm:$0xf] %vm2059_vm3, %v2536_v0  ;;  %2137 = vst.msk [vmem:[%s4029_s3 + $0x134] sm:$0xf] %vm2059_vm3, %v2600_v1 }
 0x134   :  { %v1092_v2 = vpop.f32.mrb[28].mxu0  ;;  %v1348_v3 = vpop.f32.mrb[28].mxu1 }
 0x135   :  { %v1093_v4 = vadd.f32 %v3315_v61, %v1092_v2  ;;  %v1349_v5 = vadd.f32 %v3315_v61, %v1348_v3  ;;  %v1094_v6 = vpop.f32.mrb[29].mxu0  ;;  %v1350_v7 = vpop.f32.mrb[29].mxu1 }
 0x136   :  { %v1095_v8 = vpop.f32.mrb[30].mxu0  ;;  %v1351_v9 = vpop.f32.mrb[30].mxu1 }
 0x137   :  { %v2537_v10 = vpack.c.bf16 %v1093_v4, %v1093_v4  ;;  %v2601_v11 = vpack.c.bf16 %v1349_v5, %v1349_v5  ;;  %v1096_v12 = vadd.f32 %v3315_v61, %v1095_v8  ;;  %v1352_v13 = vadd.f32 %v3315_v61, %v1351_v9  ;;  %v1097_v14 = vpop.f32.mrb[31].mxu0  ;;  %v1353_v15 = vpop.f32.mrb[31].mxu1 }
 0x139   :  { %2074 = vst.msk [vmem:[%s4029_s3 + $0x38] sm:$0xf] %vm2059_vm3, %v2537_v10  ;;  %2138 = vst.msk [vmem:[%s4029_s3 + $0x138] sm:$0xf] %vm2059_vm3, %v2601_v11  ;;  %v2538_v16 = vpack.c.bf16 %v1096_v12, %v1096_v12  ;;  %v2602_v17 = vpack.c.bf16 %v1352_v13, %v1352_v13 }
 0x13b   :  { %2075 = vst.msk [vmem:[%s4029_s3 + $0x3c] sm:$0xf] %vm2059_vm3, %v2538_v16  ;;  %2139 = vst.msk [vmem:[%s4029_s3 + $0x13c] sm:$0xf] %vm2059_vm3, %v2602_v17 }
 0x13c   :  { %v1100_v18 = vpop.f32.mrb[32].mxu0  ;;  %v1356_v19 = vpop.f32.mrb[32].mxu1 }
 0x13d   :  { %v1101_v20 = vadd.f32 %v3315_v61, %v1100_v18  ;;  %v1357_v21 = vadd.f32 %v3315_v61, %v1356_v19  ;;  %v1102_v22 = vpop.f32.mrb[33].mxu0  ;;  %v1358_v23 = vpop.f32.mrb[33].mxu1 }
 0x13e   :  { %v1103_v24 = vpop.f32.mrb[34].mxu0  ;;  %v1359_v25 = vpop.f32.mrb[34].mxu1 }
 0x13f   :  { %v2539_v26 = vpack.c.bf16 %v1101_v20, %v1101_v20  ;;  %v2603_v27 = vpack.c.bf16 %v1357_v21, %v1357_v21  ;;  %v1104_v28 = vadd.f32 %v3315_v61, %v1103_v24  ;;  %v1360_v29 = vadd.f32 %v3315_v61, %v1359_v25  ;;  %v1105_v30 = vpop.f32.mrb[35].mxu0  ;;  %v1361_v31 = vpop.f32.mrb[35].mxu1 }
 0x141   :  { %2076 = vst.msk [vmem:[%s4029_s3 + $0x40] sm:$0xf] %vm2059_vm3, %v2539_v26  ;;  %2140 = vst.msk [vmem:[%s4029_s3 + $0x140] sm:$0xf] %vm2059_vm3, %v2603_v27  ;;  %v2540_v32 = vpack.c.bf16 %v1104_v28, %v1104_v28  ;;  %v2604_v33 = vpack.c.bf16 %v1360_v29, %v1360_v29 }
 0x143   :  { %2077 = vst.msk [vmem:[%s4029_s3 + $0x44] sm:$0xf] %vm2059_vm3, %v2540_v32  ;;  %2141 = vst.msk [vmem:[%s4029_s3 + $0x144] sm:$0xf] %vm2059_vm3, %v2604_v33 }
 0x144   :  { %v1108_v34 = vpop.f32.mrb[36].mxu0  ;;  %v1364_v35 = vpop.f32.mrb[36].mxu1 }
 0x145   :  { %v1109_v36 = vadd.f32 %v3315_v61, %v1108_v34  ;;  %v1365_v37 = vadd.f32 %v3315_v61, %v1364_v35  ;;  %v1110_v38 = vpop.f32.mrb[37].mxu0  ;;  %v1366_v39 = vpop.f32.mrb[37].mxu1 }
 0x146   :  { %v1111_v40 = vpop.f32.mrb[38].mxu0  ;;  %v1367_v41 = vpop.f32.mrb[38].mxu1 }
 0x147   :  { %v2541_v42 = vpack.c.bf16 %v1109_v36, %v1109_v36  ;;  %v2605_v43 = vpack.c.bf16 %v1365_v37, %v1365_v37  ;;  %v1112_v44 = vadd.f32 %v3315_v61, %v1111_v40  ;;  %v1368_v45 = vadd.f32 %v3315_v61, %v1367_v41  ;;  %v1113_v46 = vpop.f32.mrb[39].mxu0  ;;  %v1369_v47 = vpop.f32.mrb[39].mxu1 }
 0x149   :  { %2078 = vst.msk [vmem:[%s4029_s3 + $0x48] sm:$0xf] %vm2059_vm3, %v2541_v42  ;;  %2142 = vst.msk [vmem:[%s4029_s3 + $0x148] sm:$0xf] %vm2059_vm3, %v2605_v43  ;;  %v2542_v48 = vpack.c.bf16 %v1112_v44, %v1112_v44  ;;  %v2606_v49 = vpack.c.bf16 %v1368_v45, %v1368_v45 }
 0x14b   :  { %2079 = vst.msk [vmem:[%s4029_s3 + $0x4c] sm:$0xf] %vm2059_vm3, %v2542_v48  ;;  %2143 = vst.msk [vmem:[%s4029_s3 + $0x14c] sm:$0xf] %vm2059_vm3, %v2606_v49 }
 0x14c   :  { %v1116_v50 = vpop.f32.mrb[40].mxu0  ;;  %v1372_v51 = vpop.f32.mrb[40].mxu1 }
 0x14d   :  { %v1117_v52 = vadd.f32 %v3315_v61, %v1116_v50  ;;  %v1373_v53 = vadd.f32 %v3315_v61, %v1372_v51  ;;  %v1118_v54 = vpop.f32.mrb[41].mxu0  ;;  %v1374_v55 = vpop.f32.mrb[41].mxu1 }
 0x14e   :  { %v1119_v56 = vpop.f32.mrb[42].mxu0  ;;  %v1375_v57 = vpop.f32.mrb[42].mxu1 }
 0x14f   :  { %v2543_v58 = vpack.c.bf16 %v1117_v52, %v1117_v52  ;;  %v2607_v59 = vpack.c.bf16 %v1373_v53, %v1373_v53  ;;  %v1120_v60 = vadd.f32 %v3315_v61, %v1119_v56  ;;  %v1376_v62 = vadd.f32 %v3315_v61, %v1375_v57  ;;  %v1121_v63 = vpop.f32.mrb[43].mxu0  ;;  %v1377_v0 = vpop.f32.mrb[43].mxu1 }
 0x151   :  { %2080 = vst.msk [vmem:[%s4029_s3 + $0x50] sm:$0xf] %vm2059_vm3, %v2543_v58  ;;  %2144 = vst.msk [vmem:[%s4029_s3 + $0x150] sm:$0xf] %vm2059_vm3, %v2607_v59  ;;  %v2544_v1 = vpack.c.bf16 %v1120_v60, %v1120_v60  ;;  %v2608_v2 = vpack.c.bf16 %v1376_v62, %v1376_v62 }
 0x153   :  { %2081 = vst.msk [vmem:[%s4029_s3 + $0x54] sm:$0xf] %vm2059_vm3, %v2544_v1  ;;  %2145 = vst.msk [vmem:[%s4029_s3 + $0x154] sm:$0xf] %vm2059_vm3, %v2608_v2 }
 0x154   :  { %v1124_v3 = vpop.f32.mrb[44].mxu0  ;;  %v1380_v4 = vpop.f32.mrb[44].mxu1 }
 0x155   :  { %v1125_v5 = vadd.f32 %v3315_v61, %v1124_v3  ;;  %v1381_v6 = vadd.f32 %v3315_v61, %v1380_v4  ;;  %v1126_v7 = vpop.f32.mrb[45].mxu0  ;;  %v1382_v8 = vpop.f32.mrb[45].mxu1 }
 0x156   :  { %v1127_v9 = vpop.f32.mrb[46].mxu0  ;;  %v1383_v10 = vpop.f32.mrb[46].mxu1 }
 0x157   :  { %v2545_v11 = vpack.c.bf16 %v1125_v5, %v1125_v5  ;;  %v2609_v12 = vpack.c.bf16 %v1381_v6, %v1381_v6  ;;  %v1128_v13 = vadd.f32 %v3315_v61, %v1127_v9  ;;  %v1384_v14 = vadd.f32 %v3315_v61, %v1383_v10  ;;  %v1129_v15 = vpop.f32.mrb[47].mxu0  ;;  %v1385_v16 = vpop.f32.mrb[47].mxu1 }
 0x159   :  { %2082 = vst.msk [vmem:[%s4029_s3 + $0x58] sm:$0xf] %vm2059_vm3, %v2545_v11  ;;  %2146 = vst.msk [vmem:[%s4029_s3 + $0x158] sm:$0xf] %vm2059_vm3, %v2609_v12  ;;  %v2546_v17 = vpack.c.bf16 %v1128_v13, %v1128_v13  ;;  %v2610_v18 = vpack.c.bf16 %v1384_v14, %v1384_v14 }
 0x15b   :  { %2083 = vst.msk [vmem:[%s4029_s3 + $0x5c] sm:$0xf] %vm2059_vm3, %v2546_v17  ;;  %2147 = vst.msk [vmem:[%s4029_s3 + $0x15c] sm:$0xf] %vm2059_vm3, %v2610_v18 }
 0x15c   :  { %v1132_v19 = vpop.f32.mrb[48].mxu0  ;;  %v1388_v20 = vpop.f32.mrb[48].mxu1 }
 0x15d   :  { %v1133_v21 = vadd.f32 %v3315_v61, %v1132_v19  ;;  %v1389_v22 = vadd.f32 %v3315_v61, %v1388_v20  ;;  %v1134_v23 = vpop.f32.mrb[49].mxu0  ;;  %v1390_v24 = vpop.f32.mrb[49].mxu1 }
 0x15e   :  { %v1135_v25 = vpop.f32.mrb[50].mxu0  ;;  %v1391_v26 = vpop.f32.mrb[50].mxu1 }
 0x15f   :  { %v2547_v27 = vpack.c.bf16 %v1133_v21, %v1133_v21  ;;  %v2611_v28 = vpack.c.bf16 %v1389_v22, %v1389_v22  ;;  %v1136_v29 = vadd.f32 %v3315_v61, %v1135_v25  ;;  %v1392_v30 = vadd.f32 %v3315_v61, %v1391_v26  ;;  %v1137_v31 = vpop.f32.mrb[51].mxu0  ;;  %v1393_v32 = vpop.f32.mrb[51].mxu1 }
 0x161   :  { %2084 = vst.msk [vmem:[%s4029_s3 + $0x60] sm:$0xf] %vm2059_vm3, %v2547_v27  ;;  %2148 = vst.msk [vmem:[%s4029_s3 + $0x160] sm:$0xf] %vm2059_vm3, %v2611_v28  ;;  %v2548_v33 = vpack.c.bf16 %v1136_v29, %v1136_v29  ;;  %v2612_v34 = vpack.c.bf16 %v1392_v30, %v1392_v30 }
 0x163   :  { %2085 = vst.msk [vmem:[%s4029_s3 + $0x64] sm:$0xf] %vm2059_vm3, %v2548_v33  ;;  %2149 = vst.msk [vmem:[%s4029_s3 + $0x164] sm:$0xf] %vm2059_vm3, %v2612_v34 }
 0x164   :  { %v1140_v35 = vpop.f32.mrb[52].mxu0  ;;  %v1396_v36 = vpop.f32.mrb[52].mxu1 }
 0x165   :  { %v1141_v37 = vadd.f32 %v3315_v61, %v1140_v35  ;;  %v1397_v38 = vadd.f32 %v3315_v61, %v1396_v36  ;;  %v1142_v39 = vpop.f32.mrb[53].mxu0  ;;  %v1398_v40 = vpop.f32.mrb[53].mxu1 }
 0x166   :  { %v1143_v41 = vpop.f32.mrb[54].mxu0  ;;  %v1399_v42 = vpop.f32.mrb[54].mxu1 }
 0x167   :  { %v2549_v43 = vpack.c.bf16 %v1141_v37, %v1141_v37  ;;  %v2613_v44 = vpack.c.bf16 %v1397_v38, %v1397_v38  ;;  %v1144_v45 = vadd.f32 %v3315_v61, %v1143_v41  ;;  %v1400_v46 = vadd.f32 %v3315_v61, %v1399_v42  ;;  %v1145_v47 = vpop.f32.mrb[55].mxu0  ;;  %v1401_v48 = vpop.f32.mrb[55].mxu1 }
 0x169   :  { %2086 = vst.msk [vmem:[%s4029_s3 + $0x68] sm:$0xf] %vm2059_vm3, %v2549_v43  ;;  %2150 = vst.msk [vmem:[%s4029_s3 + $0x168] sm:$0xf] %vm2059_vm3, %v2613_v44  ;;  %v2550_v49 = vpack.c.bf16 %v1144_v45, %v1144_v45  ;;  %v2614_v50 = vpack.c.bf16 %v1400_v46, %v1400_v46 }
 0x16b   :  { %2087 = vst.msk [vmem:[%s4029_s3 + $0x6c] sm:$0xf] %vm2059_vm3, %v2550_v49  ;;  %2151 = vst.msk [vmem:[%s4029_s3 + $0x16c] sm:$0xf] %vm2059_vm3, %v2614_v50 }
 0x16c   :  { %v1148_v51 = vpop.f32.mrb[56].mxu0  ;;  %v1404_v52 = vpop.f32.mrb[56].mxu1 }
 0x16d   :  { %v1149_v53 = vadd.f32 %v3315_v61, %v1148_v51  ;;  %v1405_v54 = vadd.f32 %v3315_v61, %v1404_v52  ;;  %v1150_v55 = vpop.f32.mrb[57].mxu0  ;;  %v1406_v56 = vpop.f32.mrb[57].mxu1 }
 0x16e   :  { %v1151_v57 = vpop.f32.mrb[58].mxu0  ;;  %v1407_v58 = vpop.f32.mrb[58].mxu1 }
 0x16f   :  { %v2551_v59 = vpack.c.bf16 %v1149_v53, %v1149_v53  ;;  %v2615_v60 = vpack.c.bf16 %v1405_v54, %v1405_v54  ;;  %v1152_v62 = vadd.f32 %v3315_v61, %v1151_v57  ;;  %v1408_v63 = vadd.f32 %v3315_v61, %v1407_v58  ;;  %v1153_v0 = vpop.f32.mrb[59].mxu0  ;;  %v1409_v1 = vpop.f32.mrb[59].mxu1 }
 0x171   :  { %2088 = vst.msk [vmem:[%s4029_s3 + $0x70] sm:$0xf] %vm2059_vm3, %v2551_v59  ;;  %2152 = vst.msk [vmem:[%s4029_s3 + $0x170] sm:$0xf] %vm2059_vm3, %v2615_v60  ;;  %v2552_v2 = vpack.c.bf16 %v1152_v62, %v1152_v62  ;;  %v2616_v3 = vpack.c.bf16 %v1408_v63, %v1408_v63 }
 0x173   :  { %2089 = vst.msk [vmem:[%s4029_s3 + $0x74] sm:$0xf] %vm2059_vm3, %v2552_v2  ;;  %2153 = vst.msk [vmem:[%s4029_s3 + $0x174] sm:$0xf] %vm2059_vm3, %v2616_v3 }
 0x174   :  { %v1156_v4 = vpop.f32.mrb[60].mxu0  ;;  %v1412_v5 = vpop.f32.mrb[60].mxu1 }
 0x175   :  { %v1157_v6 = vadd.f32 %v3315_v61, %v1156_v4  ;;  %v1413_v7 = vadd.f32 %v3315_v61, %v1412_v5  ;;  %v1158_v8 = vpop.f32.mrb[61].mxu0  ;;  %v1414_v9 = vpop.f32.mrb[61].mxu1 }
 0x176   :  { %v1159_v10 = vpop.f32.mrb[62].mxu0  ;;  %v1415_v11 = vpop.f32.mrb[62].mxu1 }
 0x177   :  { %v2553_v12 = vpack.c.bf16 %v1157_v6, %v1157_v6  ;;  %v2617_v13 = vpack.c.bf16 %v1413_v7, %v1413_v7  ;;  %v1160_v14 = vadd.f32 %v3315_v61, %v1159_v10  ;;  %v1416_v15 = vadd.f32 %v3315_v61, %v1415_v11  ;;  %v1161_v16 = vpop.f32.mrb[63].mxu0  ;;  %v1417_v17 = vpop.f32.mrb[63].mxu1 }
 0x179   :  { %2090 = vst.msk [vmem:[%s4029_s3 + $0x78] sm:$0xf] %vm2059_vm3, %v2553_v12  ;;  %2154 = vst.msk [vmem:[%s4029_s3 + $0x178] sm:$0xf] %vm2059_vm3, %v2617_v13  ;;  %v2554_v18 = vpack.c.bf16 %v1160_v14, %v1160_v14  ;;  %v2618_v19 = vpack.c.bf16 %v1416_v15, %v1416_v15 }
 0x17b   :  { %2091 = vst.msk [vmem:[%s4029_s3 + $0x7c] sm:$0xf] %vm2059_vm3, %v2554_v18  ;;  %2155 = vst.msk [vmem:[%s4029_s3 + $0x17c] sm:$0xf] %vm2059_vm3, %v2618_v19 }
 0x17c   :  { %v1164_v20 = vpop.f32.mrb[64].mxu0  ;;  %v1420_v21 = vpop.f32.mrb[64].mxu1 }
 0x17d   :  { %v1165_v22 = vadd.f32 %v3315_v61, %v1164_v20  ;;  %v1421_v23 = vadd.f32 %v3315_v61, %v1420_v21  ;;  %v1166_v24 = vpop.f32.mrb[65].mxu0  ;;  %v1422_v25 = vpop.f32.mrb[65].mxu1 }
 0x17e   :  { %v1167_v26 = vpop.f32.mrb[66].mxu0  ;;  %v1423_v27 = vpop.f32.mrb[66].mxu1 }
 0x17f   :  { %v2555_v28 = vpack.c.bf16 %v1165_v22, %v1165_v22  ;;  %v2619_v29 = vpack.c.bf16 %v1421_v23, %v1421_v23  ;;  %v1168_v30 = vadd.f32 %v3315_v61, %v1167_v26  ;;  %v1424_v31 = vadd.f32 %v3315_v61, %v1423_v27  ;;  %v1169_v32 = vpop.f32.mrb[67].mxu0  ;;  %v1425_v33 = vpop.f32.mrb[67].mxu1 }
 0x181   :  { %2092 = vst.msk [vmem:[%s4029_s3 + $0x80] sm:$0xf] %vm2059_vm3, %v2555_v28  ;;  %2156 = vst.msk [vmem:[%s4029_s3 + $0x180] sm:$0xf] %vm2059_vm3, %v2619_v29  ;;  %v2556_v34 = vpack.c.bf16 %v1168_v30, %v1168_v30  ;;  %v2620_v35 = vpack.c.bf16 %v1424_v31, %v1424_v31 }
 0x183   :  { %2093 = vst.msk [vmem:[%s4029_s3 + $0x84] sm:$0xf] %vm2059_vm3, %v2556_v34  ;;  %2157 = vst.msk [vmem:[%s4029_s3 + $0x184] sm:$0xf] %vm2059_vm3, %v2620_v35 }
 0x184   :  { %v1172_v36 = vpop.f32.mrb[68].mxu0  ;;  %v1428_v37 = vpop.f32.mrb[68].mxu1 }
 0x185   :  { %v1173_v38 = vadd.f32 %v3315_v61, %v1172_v36  ;;  %v1429_v39 = vadd.f32 %v3315_v61, %v1428_v37  ;;  %v1174_v40 = vpop.f32.mrb[69].mxu0  ;;  %v1430_v41 = vpop.f32.mrb[69].mxu1 }
 0x186   :  { %v1175_v42 = vpop.f32.mrb[70].mxu0  ;;  %v1431_v43 = vpop.f32.mrb[70].mxu1 }
 0x187   :  { %v2557_v44 = vpack.c.bf16 %v1173_v38, %v1173_v38  ;;  %v2621_v45 = vpack.c.bf16 %v1429_v39, %v1429_v39  ;;  %v1176_v46 = vadd.f32 %v3315_v61, %v1175_v42  ;;  %v1432_v47 = vadd.f32 %v3315_v61, %v1431_v43  ;;  %v1177_v48 = vpop.f32.mrb[71].mxu0  ;;  %v1433_v49 = vpop.f32.mrb[71].mxu1 }
 0x189   :  { %2094 = vst.msk [vmem:[%s4029_s3 + $0x88] sm:$0xf] %vm2059_vm3, %v2557_v44  ;;  %2158 = vst.msk [vmem:[%s4029_s3 + $0x188] sm:$0xf] %vm2059_vm3, %v2621_v45  ;;  %v2558_v50 = vpack.c.bf16 %v1176_v46, %v1176_v46  ;;  %v2622_v51 = vpack.c.bf16 %v1432_v47, %v1432_v47 }
 0x18b   :  { %2095 = vst.msk [vmem:[%s4029_s3 + $0x8c] sm:$0xf] %vm2059_vm3, %v2558_v50  ;;  %2159 = vst.msk [vmem:[%s4029_s3 + $0x18c] sm:$0xf] %vm2059_vm3, %v2622_v51 }
 0x18c   :  { %v1180_v52 = vpop.f32.mrb[72].mxu0  ;;  %v1436_v53 = vpop.f32.mrb[72].mxu1 }
 0x18d   :  { %v1181_v54 = vadd.f32 %v3315_v61, %v1180_v52  ;;  %v1437_v55 = vadd.f32 %v3315_v61, %v1436_v53  ;;  %v1182_v56 = vpop.f32.mrb[73].mxu0  ;;  %v1438_v57 = vpop.f32.mrb[73].mxu1 }
 0x18e   :  { %v1183_v58 = vpop.f32.mrb[74].mxu0  ;;  %v1439_v59 = vpop.f32.mrb[74].mxu1 }
 0x18f   :  { %v2559_v60 = vpack.c.bf16 %v1181_v54, %v1181_v54  ;;  %v2623_v62 = vpack.c.bf16 %v1437_v55, %v1437_v55  ;;  %v1184_v63 = vadd.f32 %v3315_v61, %v1183_v58  ;;  %v1440_v0 = vadd.f32 %v3315_v61, %v1439_v59  ;;  %v1185_v1 = vpop.f32.mrb[75].mxu0  ;;  %v1441_v2 = vpop.f32.mrb[75].mxu1 }
 0x191   :  { %2096 = vst.msk [vmem:[%s4029_s3 + $0x90] sm:$0xf] %vm2059_vm3, %v2559_v60  ;;  %2160 = vst.msk [vmem:[%s4029_s3 + $0x190] sm:$0xf] %vm2059_vm3, %v2623_v62  ;;  %v2560_v3 = vpack.c.bf16 %v1184_v63, %v1184_v63  ;;  %v2624_v4 = vpack.c.bf16 %v1440_v0, %v1440_v0 }
 0x193   :  { %2097 = vst.msk [vmem:[%s4029_s3 + $0x94] sm:$0xf] %vm2059_vm3, %v2560_v3  ;;  %2161 = vst.msk [vmem:[%s4029_s3 + $0x194] sm:$0xf] %vm2059_vm3, %v2624_v4 }
 0x194   :  { %v1188_v5 = vpop.f32.mrb[76].mxu0  ;;  %v1444_v6 = vpop.f32.mrb[76].mxu1 }
 0x195   :  { %v1189_v7 = vadd.f32 %v3315_v61, %v1188_v5  ;;  %v1445_v8 = vadd.f32 %v3315_v61, %v1444_v6  ;;  %v1190_v9 = vpop.f32.mrb[77].mxu0  ;;  %v1446_v10 = vpop.f32.mrb[77].mxu1 }
 0x196   :  { %v1191_v11 = vpop.f32.mrb[78].mxu0  ;;  %v1447_v12 = vpop.f32.mrb[78].mxu1 }
 0x197   :  { %v2561_v13 = vpack.c.bf16 %v1189_v7, %v1189_v7  ;;  %v2625_v14 = vpack.c.bf16 %v1445_v8, %v1445_v8  ;;  %v1192_v15 = vadd.f32 %v3315_v61, %v1191_v11  ;;  %v1448_v16 = vadd.f32 %v3315_v61, %v1447_v12  ;;  %v1193_v17 = vpop.f32.mrb[79].mxu0  ;;  %v1449_v18 = vpop.f32.mrb[79].mxu1 }
 0x198   :  { %v3847_v17 = vld [vmem:[%s4028_s2] ss:$0 sm:$0xff] }
 0x199   :  { %2098 = vst.msk [vmem:[%s4029_s3 + $0x98] sm:$0xf] %vm2059_vm3, %v2561_v13  ;;  %2162 = vst.msk [vmem:[%s4029_s3 + $0x198] sm:$0xf] %vm2059_vm3, %v2625_v14  ;;  %v2562_v19 = vpack.c.bf16 %v1192_v15, %v1192_v15  ;;  %v2626_v20 = vpack.c.bf16 %v1448_v16, %v1448_v16 }
 0x19b   :  { %2099 = vst.msk [vmem:[%s4029_s3 + $0x9c] sm:$0xf] %vm2059_vm3, %v2562_v19  ;;  %2163 = vst.msk [vmem:[%s4029_s3 + $0x19c] sm:$0xf] %vm2059_vm3, %v2626_v20 }
 0x19c   :  { %v1196_v21 = vpop.f32.mrb[80].mxu0  ;;  %v1452_v22 = vpop.f32.mrb[80].mxu1 }
 0x19d   :  { %v1197_v23 = vadd.f32 %v3315_v61, %v1196_v21  ;;  %v1453_v24 = vadd.f32 %v3315_v61, %v1452_v22  ;;  %v1198_v25 = vpop.f32.mrb[81].mxu0  ;;  %v1454_v26 = vpop.f32.mrb[81].mxu1 }
 0x19e   :  { %v1199_v27 = vpop.f32.mrb[82].mxu0  ;;  %v1455_v28 = vpop.f32.mrb[82].mxu1 }
 0x19f   :  { %v2563_v29 = vpack.c.bf16 %v1197_v23, %v1197_v23  ;;  %v2627_v30 = vpack.c.bf16 %v1453_v24, %v1453_v24  ;;  %v1200_v31 = vadd.f32 %v3315_v61, %v1199_v27  ;;  %v1456_v32 = vadd.f32 %v3315_v61, %v1455_v28  ;;  %v1201_v33 = vpop.f32.mrb[83].mxu0  ;;  %v1457_v34 = vpop.f32.mrb[83].mxu1 }
 0x1a1   :  { %2100 = vst.msk [vmem:[%s4029_s3 + $0xa0] sm:$0xf] %vm2059_vm3, %v2563_v29  ;;  %2164 = vst.msk [vmem:[%s4029_s3 + $0x1a0] sm:$0xf] %vm2059_vm3, %v2627_v30  ;;  %v2564_v35 = vpack.c.bf16 %v1200_v31, %v1200_v31  ;;  %v2628_v36 = vpack.c.bf16 %v1456_v32, %v1456_v32 }
 0x1a3   :  { %2101 = vst.msk [vmem:[%s4029_s3 + $0xa4] sm:$0xf] %vm2059_vm3, %v2564_v35  ;;  %2165 = vst.msk [vmem:[%s4029_s3 + $0x1a4] sm:$0xf] %vm2059_vm3, %v2628_v36 }
 0x1a4   :  { %v1204_v37 = vpop.f32.mrb[84].mxu0  ;;  %v1460_v38 = vpop.f32.mrb[84].mxu1 }
 0x1a5   :  { %v1205_v39 = vadd.f32 %v3315_v61, %v1204_v37  ;;  %v1461_v40 = vadd.f32 %v3315_v61, %v1460_v38  ;;  %v1206_v41 = vpop.f32.mrb[85].mxu0  ;;  %v1462_v42 = vpop.f32.mrb[85].mxu1 }
 0x1a6   :  { %v1207_v43 = vpop.f32.mrb[86].mxu0  ;;  %v1463_v44 = vpop.f32.mrb[86].mxu1 }
 0x1a7   :  { %v2565_v45 = vpack.c.bf16 %v1205_v39, %v1205_v39  ;;  %v2629_v46 = vpack.c.bf16 %v1461_v40, %v1461_v40  ;;  %v1208_v47 = vadd.f32 %v3315_v61, %v1207_v43  ;;  %v1464_v48 = vadd.f32 %v3315_v61, %v1463_v44  ;;  %v1209_v49 = vpop.f32.mrb[87].mxu0  ;;  %v1465_v50 = vpop.f32.mrb[87].mxu1 }
 0x1a9   :  { %2102 = vst.msk [vmem:[%s4029_s3 + $0xa8] sm:$0xf] %vm2059_vm3, %v2565_v45  ;;  %2166 = vst.msk [vmem:[%s4029_s3 + $0x1a8] sm:$0xf] %vm2059_vm3, %v2629_v46  ;;  %v2566_v51 = vpack.c.bf16 %v1208_v47, %v1208_v47  ;;  %v2630_v52 = vpack.c.bf16 %v1464_v48, %v1464_v48 }
 0x1ab   :  { %2103 = vst.msk [vmem:[%s4029_s3 + $0xac] sm:$0xf] %vm2059_vm3, %v2566_v51  ;;  %2167 = vst.msk [vmem:[%s4029_s3 + $0x1ac] sm:$0xf] %vm2059_vm3, %v2630_v52 }
 0x1ac   :  { %v1212_v53 = vpop.f32.mrb[88].mxu0  ;;  %v1468_v54 = vpop.f32.mrb[88].mxu1 }
 0x1ad   :  { %v1213_v55 = vadd.f32 %v3315_v61, %v1212_v53  ;;  %v1469_v56 = vadd.f32 %v3315_v61, %v1468_v54  ;;  %v1214_v57 = vpop.f32.mrb[89].mxu0  ;;  %v1470_v58 = vpop.f32.mrb[89].mxu1 }
 0x1ae   :  { %v1215_v59 = vpop.f32.mrb[90].mxu0  ;;  %v1471_v60 = vpop.f32.mrb[90].mxu1 }
 0x1af   :  { %v2567_v62 = vpack.c.bf16 %v1213_v55, %v1213_v55  ;;  %v2631_v63 = vpack.c.bf16 %v1469_v56, %v1469_v56  ;;  %v1216_v0 = vadd.f32 %v3315_v61, %v1215_v59  ;;  %v1472_v1 = vadd.f32 %v3315_v61, %v1471_v60  ;;  %v1217_v2 = vpop.f32.mrb[91].mxu0  ;;  %v1473_v3 = vpop.f32.mrb[91].mxu1 }
 0x1b1   :  { %2104 = vst.msk [vmem:[%s4029_s3 + $0xb0] sm:$0xf] %vm2059_vm3, %v2567_v62  ;;  %2168 = vst.msk [vmem:[%s4029_s3 + $0x1b0] sm:$0xf] %vm2059_vm3, %v2631_v63  ;;  %v2568_v4 = vpack.c.bf16 %v1216_v0, %v1216_v0  ;;  %v2632_v5 = vpack.c.bf16 %v1472_v1, %v1472_v1 }
 0x1b3   :  { %2105 = vst.msk [vmem:[%s4029_s3 + $0xb4] sm:$0xf] %vm2059_vm3, %v2568_v4  ;;  %2169 = vst.msk [vmem:[%s4029_s3 + $0x1b4] sm:$0xf] %vm2059_vm3, %v2632_v5 }
 0x1b4   :  { %v1220_v6 = vpop.f32.mrb[92].mxu0  ;;  %v1476_v7 = vpop.f32.mrb[92].mxu1 }
 0x1b5   :  { %v1221_v8 = vadd.f32 %v3315_v61, %v1220_v6  ;;  %v1477_v9 = vadd.f32 %v3315_v61, %v1476_v7  ;;  %v1222_v10 = vpop.f32.mrb[93].mxu0  ;;  %v1478_v11 = vpop.f32.mrb[93].mxu1 }
 0x1b6   :  { %v1223_v12 = vpop.f32.mrb[94].mxu0  ;;  %v1479_v13 = vpop.f32.mrb[94].mxu1 }
 0x1b7   :  { %v2569_v14 = vpack.c.bf16 %v1221_v8, %v1221_v8  ;;  %v2633_v15 = vpack.c.bf16 %v1477_v9, %v1477_v9  ;;  %v1224_v16 = vadd.f32 %v3315_v61, %v1223_v12  ;;  %v1480_v18 = vadd.f32 %v3847_v17, %v1479_v13  ;;  %v1225_v19 = vpop.f32.mrb[95].mxu0  ;;  %v1481_v20 = vpop.f32.mrb[95].mxu1 }
 0x1b9   :  { %2106 = vst.msk [vmem:[%s4029_s3 + $0xb8] sm:$0xf] %vm2059_vm3, %v2569_v14  ;;  %2170 = vst.msk [vmem:[%s4029_s3 + $0x1b8] sm:$0xf] %vm2059_vm3, %v2633_v15  ;;  %v2570_v61 = vpack.c.bf16 %v1224_v16, %v1224_v16  ;;  %v2634_v21 = vpack.c.bf16 %v1480_v18, %v1480_v18 }
 0x1bb   :  { %2107 = vst.msk [vmem:[%s4029_s3 + $0xbc] sm:$0xf] %vm2059_vm3, %v2570_v61  ;;  %2171 = vst.msk [vmem:[%s4029_s3 + $0x1bc] sm:$0xf] %vm2059_vm3, %v2634_v21 }
 0x1bc   :  { %v1228_v22 = vpop.f32.mrb[96].mxu0  ;;  %v1484_v23 = vpop.f32.mrb[96].mxu1 }
 0x1bd   :  { %v1229_v24 = vadd.f32 %v3847_v17, %v1228_v22  ;;  %v1485_v25 = vadd.f32 %v3847_v17, %v1484_v23  ;;  %v1230_v26 = vpop.f32.mrb[97].mxu0  ;;  %v1486_v27 = vpop.f32.mrb[97].mxu1 }
 0x1be   :  { %v1231_v28 = vpop.f32.mrb[98].mxu0  ;;  %v1487_v29 = vpop.f32.mrb[98].mxu1 }
 0x1bf   :  { %v2571_v30 = vpack.c.bf16 %v1229_v24, %v1229_v24  ;;  %v2635_v31 = vpack.c.bf16 %v1485_v25, %v1485_v25  ;;  %v1232_v32 = vadd.f32 %v3847_v17, %v1231_v28  ;;  %v1488_v33 = vadd.f32 %v3847_v17, %v1487_v29  ;;  %v1233_v34 = vpop.f32.mrb[99].mxu0  ;;  %v1489_v35 = vpop.f32.mrb[99].mxu1 }
 0x1c1   :  { %2108 = vst.msk [vmem:[%s4029_s3 + $0xc0] sm:$0xf] %vm2059_vm3, %v2571_v30  ;;  %2172 = vst.msk [vmem:[%s4029_s3 + $0x1c0] sm:$0xf] %vm2059_vm3, %v2635_v31  ;;  %v2572_v36 = vpack.c.bf16 %v1232_v32, %v1232_v32  ;;  %v2636_v37 = vpack.c.bf16 %v1488_v33, %v1488_v33 }
 0x1c3   :  { %2109 = vst.msk [vmem:[%s4029_s3 + $0xc4] sm:$0xf] %vm2059_vm3, %v2572_v36  ;;  %2173 = vst.msk [vmem:[%s4029_s3 + $0x1c4] sm:$0xf] %vm2059_vm3, %v2636_v37 }
 0x1c4   :  { %v1236_v38 = vpop.f32.mrb[100].mxu0  ;;  %v1492_v39 = vpop.f32.mrb[100].mxu1 }
 0x1c5   :  { %v1237_v40 = vadd.f32 %v3847_v17, %v1236_v38  ;;  %v1493_v41 = vadd.f32 %v3847_v17, %v1492_v39  ;;  %v1238_v42 = vpop.f32.mrb[101].mxu0  ;;  %v1494_v43 = vpop.f32.mrb[101].mxu1 }
 0x1c6   :  { %v1239_v44 = vpop.f32.mrb[102].mxu0  ;;  %v1495_v45 = vpop.f32.mrb[102].mxu1 }
 0x1c7   :  { %v2573_v46 = vpack.c.bf16 %v1237_v40, %v1237_v40  ;;  %v2637_v47 = vpack.c.bf16 %v1493_v41, %v1493_v41  ;;  %v1240_v48 = vadd.f32 %v3847_v17, %v1239_v44  ;;  %v1496_v49 = vadd.f32 %v3847_v17, %v1495_v45  ;;  %v1241_v50 = vpop.f32.mrb[103].mxu0  ;;  %v1497_v51 = vpop.f32.mrb[103].mxu1 }
 0x1c9   :  { %2110 = vst.msk [vmem:[%s4029_s3 + $0xc8] sm:$0xf] %vm2059_vm3, %v2573_v46  ;;  %2174 = vst.msk [vmem:[%s4029_s3 + $0x1c8] sm:$0xf] %vm2059_vm3, %v2637_v47  ;;  %v2574_v52 = vpack.c.bf16 %v1240_v48, %v1240_v48  ;;  %v2638_v53 = vpack.c.bf16 %v1496_v49, %v1496_v49 }
 0x1cb   :  { %2111 = vst.msk [vmem:[%s4029_s3 + $0xcc] sm:$0xf] %vm2059_vm3, %v2574_v52  ;;  %2175 = vst.msk [vmem:[%s4029_s3 + $0x1cc] sm:$0xf] %vm2059_vm3, %v2638_v53 }
 0x1cc   :  { %v1244_v54 = vpop.f32.mrb[104].mxu0  ;;  %v1500_v55 = vpop.f32.mrb[104].mxu1 }
 0x1cd   :  { %v1245_v56 = vadd.f32 %v3847_v17, %v1244_v54  ;;  %v1501_v57 = vadd.f32 %v3847_v17, %v1500_v55  ;;  %v1246_v58 = vpop.f32.mrb[105].mxu0  ;;  %v1502_v59 = vpop.f32.mrb[105].mxu1 }
 0x1ce   :  { %v1247_v60 = vpop.f32.mrb[106].mxu0  ;;  %v1503_v62 = vpop.f32.mrb[106].mxu1 }
 0x1cf   :  { %v2575_v63 = vpack.c.bf16 %v1245_v56, %v1245_v56  ;;  %v2639_v0 = vpack.c.bf16 %v1501_v57, %v1501_v57  ;;  %v1248_v1 = vadd.f32 %v3847_v17, %v1247_v60  ;;  %v1504_v2 = vadd.f32 %v3847_v17, %v1503_v62  ;;  %v1249_v3 = vpop.f32.mrb[107].mxu0  ;;  %v1505_v4 = vpop.f32.mrb[107].mxu1 }
 0x1d1   :  { %2112 = vst.msk [vmem:[%s4029_s3 + $0xd0] sm:$0xf] %vm2059_vm3, %v2575_v63  ;;  %2176 = vst.msk [vmem:[%s4029_s3 + $0x1d0] sm:$0xf] %vm2059_vm3, %v2639_v0  ;;  %v2576_v5 = vpack.c.bf16 %v1248_v1, %v1248_v1  ;;  %v2640_v6 = vpack.c.bf16 %v1504_v2, %v1504_v2 }
 0x1d3   :  { %2113 = vst.msk [vmem:[%s4029_s3 + $0xd4] sm:$0xf] %vm2059_vm3, %v2576_v5  ;;  %2177 = vst.msk [vmem:[%s4029_s3 + $0x1d4] sm:$0xf] %vm2059_vm3, %v2640_v6 }
 0x1d4   :  { %v1252_v7 = vpop.f32.mrb[108].mxu0  ;;  %v1508_v8 = vpop.f32.mrb[108].mxu1 }
 0x1d5   :  { %v1253_v9 = vadd.f32 %v3847_v17, %v1252_v7  ;;  %v1509_v10 = vadd.f32 %v3847_v17, %v1508_v8  ;;  %v1254_v11 = vpop.f32.mrb[109].mxu0  ;;  %v1510_v12 = vpop.f32.mrb[109].mxu1 }
 0x1d6   :  { %v1255_v13 = vpop.f32.mrb[110].mxu0  ;;  %v1511_v14 = vpop.f32.mrb[110].mxu1 }
 0x1d7   :  { %v2577_v15 = vpack.c.bf16 %v1253_v9, %v1253_v9  ;;  %v2641_v16 = vpack.c.bf16 %v1509_v10, %v1509_v10  ;;  %v1256_v18 = vadd.f32 %v3847_v17, %v1255_v13  ;;  %v1512_v19 = vadd.f32 %v3847_v17, %v1511_v14  ;;  %v1257_v20 = vpop.f32.mrb[111].mxu0  ;;  %v1513_v61 = vpop.f32.mrb[111].mxu1 }
 0x1d9   :  { %2114 = vst.msk [vmem:[%s4029_s3 + $0xd8] sm:$0xf] %vm2059_vm3, %v2577_v15  ;;  %2178 = vst.msk [vmem:[%s4029_s3 + $0x1d8] sm:$0xf] %vm2059_vm3, %v2641_v16  ;;  %v2578_v21 = vpack.c.bf16 %v1256_v18, %v1256_v18  ;;  %v2642_v22 = vpack.c.bf16 %v1512_v19, %v1512_v19 }
 0x1db   :  { %2115 = vst.msk [vmem:[%s4029_s3 + $0xdc] sm:$0xf] %vm2059_vm3, %v2578_v21  ;;  %2179 = vst.msk [vmem:[%s4029_s3 + $0x1dc] sm:$0xf] %vm2059_vm3, %v2642_v22 }
 0x1dc   :  { %v1260_v23 = vpop.f32.mrb[112].mxu0  ;;  %v1516_v24 = vpop.f32.mrb[112].mxu1 }
 0x1dd   :  { %v1261_v25 = vadd.f32 %v3847_v17, %v1260_v23  ;;  %v1517_v26 = vadd.f32 %v3847_v17, %v1516_v24  ;;  %v1262_v27 = vpop.f32.mrb[113].mxu0  ;;  %v1518_v28 = vpop.f32.mrb[113].mxu1 }
 0x1de   :  { %v1263_v29 = vpop.f32.mrb[114].mxu0  ;;  %v1519_v30 = vpop.f32.mrb[114].mxu1 }
 0x1df   :  { %v2579_v31 = vpack.c.bf16 %v1261_v25, %v1261_v25  ;;  %v2643_v32 = vpack.c.bf16 %v1517_v26, %v1517_v26  ;;  %v1264_v33 = vadd.f32 %v3847_v17, %v1263_v29  ;;  %v1520_v34 = vadd.f32 %v3847_v17, %v1519_v30  ;;  %v1265_v35 = vpop.f32.mrb[115].mxu0  ;;  %v1521_v36 = vpop.f32.mrb[115].mxu1 }
 0x1e1   :  { %2116 = vst.msk [vmem:[%s4029_s3 + $0xe0] sm:$0xf] %vm2059_vm3, %v2579_v31  ;;  %2180 = vst.msk [vmem:[%s4029_s3 + $0x1e0] sm:$0xf] %vm2059_vm3, %v2643_v32  ;;  %v2580_v37 = vpack.c.bf16 %v1264_v33, %v1264_v33  ;;  %v2644_v38 = vpack.c.bf16 %v1520_v34, %v1520_v34 }
 0x1e3   :  { %2117 = vst.msk [vmem:[%s4029_s3 + $0xe4] sm:$0xf] %vm2059_vm3, %v2580_v37  ;;  %2181 = vst.msk [vmem:[%s4029_s3 + $0x1e4] sm:$0xf] %vm2059_vm3, %v2644_v38 }
 0x1e4   :  { %v1268_v39 = vpop.f32.mrb[116].mxu0  ;;  %v1524_v40 = vpop.f32.mrb[116].mxu1 }
 0x1e5   :  { %v1269_v41 = vadd.f32 %v3847_v17, %v1268_v39  ;;  %v1525_v42 = vadd.f32 %v3847_v17, %v1524_v40  ;;  %v1270_v43 = vpop.f32.mrb[117].mxu0  ;;  %v1526_v44 = vpop.f32.mrb[117].mxu1 }
 0x1e6   :  { %v1271_v45 = vpop.f32.mrb[118].mxu0  ;;  %v1527_v46 = vpop.f32.mrb[118].mxu1 }
 0x1e7   :  { %v2581_v47 = vpack.c.bf16 %v1269_v41, %v1269_v41  ;;  %v2645_v48 = vpack.c.bf16 %v1525_v42, %v1525_v42  ;;  %v1272_v49 = vadd.f32 %v3847_v17, %v1271_v45  ;;  %v1528_v50 = vadd.f32 %v3847_v17, %v1527_v46  ;;  %v1273_v51 = vpop.f32.mrb[119].mxu0  ;;  %v1529_v52 = vpop.f32.mrb[119].mxu1 }
 0x1e9   :  { %2118 = vst.msk [vmem:[%s4029_s3 + $0xe8] sm:$0xf] %vm2059_vm3, %v2581_v47  ;;  %2182 = vst.msk [vmem:[%s4029_s3 + $0x1e8] sm:$0xf] %vm2059_vm3, %v2645_v48  ;;  %v2582_v53 = vpack.c.bf16 %v1272_v49, %v1272_v49  ;;  %v2646_v54 = vpack.c.bf16 %v1528_v50, %v1528_v50 }
 0x1eb   :  { %2119 = vst.msk [vmem:[%s4029_s3 + $0xec] sm:$0xf] %vm2059_vm3, %v2582_v53  ;;  %2183 = vst.msk [vmem:[%s4029_s3 + $0x1ec] sm:$0xf] %vm2059_vm3, %v2646_v54 }
 0x1ec   :  { %v1276_v55 = vpop.f32.mrb[120].mxu0  ;;  %v1532_v56 = vpop.f32.mrb[120].mxu1 }
 0x1ed   :  { %v1277_v57 = vadd.f32 %v3847_v17, %v1276_v55  ;;  %v1533_v58 = vadd.f32 %v3847_v17, %v1532_v56  ;;  %v1278_v59 = vpop.f32.mrb[121].mxu0  ;;  %v1534_v60 = vpop.f32.mrb[121].mxu1 }
 0x1ee   :  { %v1279_v62 = vpop.f32.mrb[122].mxu0  ;;  %v1535_v63 = vpop.f32.mrb[122].mxu1 }
 0x1ef   :  { %v2583_v0 = vpack.c.bf16 %v1277_v57, %v1277_v57  ;;  %v2647_v1 = vpack.c.bf16 %v1533_v58, %v1533_v58  ;;  %v1280_v2 = vadd.f32 %v3847_v17, %v1279_v62  ;;  %v1536_v3 = vadd.f32 %v3847_v17, %v1535_v63  ;;  %v1281_v4 = vpop.f32.mrb[123].mxu0  ;;  %v1537_v5 = vpop.f32.mrb[123].mxu1 }
 0x1f1   :  { %2120 = vst.msk [vmem:[%s4029_s3 + $0xf0] sm:$0xf] %vm2059_vm3, %v2583_v0  ;;  %2184 = vst.msk [vmem:[%s4029_s3 + $0x1f0] sm:$0xf] %vm2059_vm3, %v2647_v1  ;;  %v2584_v6 = vpack.c.bf16 %v1280_v2, %v1280_v2  ;;  %v2648_v7 = vpack.c.bf16 %v1536_v3, %v1536_v3 }
 0x1f3   :  { %2121 = vst.msk [vmem:[%s4029_s3 + $0xf4] sm:$0xf] %vm2059_vm3, %v2584_v6  ;;  %2185 = vst.msk [vmem:[%s4029_s3 + $0x1f4] sm:$0xf] %vm2059_vm3, %v2648_v7 }
 0x1f4   :  { %v1284_v8 = vpop.f32.mrb[124].mxu0  ;;  %v1540_v9 = vpop.f32.mrb[124].mxu1 }
 0x1f5   :  { %v1285_v10 = vadd.f32 %v3847_v17, %v1284_v8  ;;  %v1541_v11 = vadd.f32 %v3847_v17, %v1540_v9  ;;  %v1286_v12 = vpop.f32.mrb[125].mxu0  ;;  %v1542_v13 = vpop.f32.mrb[125].mxu1 }
 0x1f6   :  { %v1287_v14 = vpop.f32.mrb[126].mxu0  ;;  %v1543_v15 = vpop.f32.mrb[126].mxu1 }
 0x1f7   :  { %v2585_v16 = vpack.c.bf16 %v1285_v10, %v1285_v10  ;;  %v2649_v18 = vpack.c.bf16 %v1541_v11, %v1541_v11  ;;  %v1288_v19 = vadd.f32 %v3847_v17, %v1287_v14  ;;  %v1544_v20 = vadd.f32 %v3847_v17, %v1543_v15  ;;  %v1289_v61 = vpop.f32.mrb[127].mxu0  ;;  %v1545_v21 = vpop.f32.mrb[127].mxu1 }
 0x1f9   :  { %2122 = vst.msk [vmem:[%s4029_s3 + $0xf8] sm:$0xf] %vm2059_vm3, %v2585_v16  ;;  %2186 = vst.msk [vmem:[%s4029_s3 + $0x1f8] sm:$0xf] %vm2059_vm3, %v2649_v18  ;;  %v2586_v22 = vpack.c.bf16 %v1288_v19, %v1288_v19  ;;  %v2650_v23 = vpack.c.bf16 %v1544_v20, %v1544_v20 }
 0x1fb   :  { %2123 = vst.msk [vmem:[%s4029_s3 + $0xfc] sm:$0xf] %vm2059_vm3, %v2586_v22  ;;  %2187 = vst.msk [vmem:[%s4029_s3 + $0x1fc] sm:$0xf] %vm2059_vm3, %v2650_v23 }

</bundles_post_ra>
